<compile_context>
chip_gen: v5e
topology: v5e:2x2
jax: 0.10.0
libtpu: 0.0.40
codegen_flags: <defaults>
</compile_context>

<pallas_src>
import numpy as np
import jax
import jax.numpy as jnp
from jax.experimental import pallas as pl
from jax.experimental.pallas import tpu as pltpu

NEG_BIG = -1e30
LANE = 128


def _round_up(v, m):
    return ((v + m - 1) // m) * m


def _mxu_operand_dtype():
    # bf16 operands on the bf16-native v5/v6 MXUs (accumulation stays f32);
    # f32 on other / unknown generations.  The StAS matmuls are always f32.
    try:
        kind = jax.devices()[0].device_kind.lower()
        if ("v5" in kind) or ("v6" in kind):
            return jnp.bfloat16
    except Exception:
        pass
    return jnp.float32


def _default_vmem_limit():
    # ~3/4 of physical VMEM, capped at 96 MiB (v5e/v6e: 128 MiB -> 96 MiB,
    # v7x: 64 MiB -> 48 MiB).  Conservative 48 MiB fallback.
    try:
        cap = pltpu.get_tpu_info().vmem_capacity_bytes
        return int(min(cap * 3 // 4, 96 * 1024 * 1024))
    except Exception:
        return 48 * 1024 * 1024


MXU_DTYPE = _mxu_operand_dtype()
VMEM_LIMIT = _default_vmem_limit()


def _leaky_relu(x, slope=0.01):
    return jnp.where(x >= 0, x, slope * x)


def _masked_row_softmax(scores, m):
    """Softmax over the last axis restricted to mask m (rows with empty mask -> 0).
    Equivalent to torch_geometric.utils.softmax grouped by the row index.
    exp() runs on the already-masked scores (no transient inf) and the divide
    uses the EUP reciprocal (kernel-only helper)."""
    masked = jnp.where(m, scores, NEG_BIG)
    row_max = jnp.max(masked, axis=-1, keepdims=True)
    e = jnp.where(m, jnp.exp(masked - row_max), 0.0)
    denom = jnp.sum(e, axis=-1, keepdims=True)
    return e * pl.reciprocal(denom + 1e-16, approx=True)


# --------- Kernel 1: calculate_fitness ('both_c') + Cluster_assignment ----------
# Grid over row tiles of N ("arbitrary": cluster-score column sums accumulate
# across tiles in VMEM scratch; on v7x this could be restructured into per-tile
# partial sums + wrapper reduce to enable "parallel" across both TensorCores).
def _fitness_kernel(xn_ref, xnT_ref, acol_ref, crow_ref, mask_ref,
                    fit_ref, cscore_ref, sum_acc, cnt_acc):
    i = pl.program_id(0)

    @pl.when(i == 0)
    def _():
        sum_acc[...] = jnp.zeros_like(sum_acc)
        cnt_acc[...] = jnp.zeros_like(cnt_acc)

    mf = mask_ref[...].astype(jnp.float32)   # (TM, Np) int8 cluster-edge mask -> f32
    m = mf > 0                               # boolean computed once, reused 3x

    # cosine ('c') fitness: all-pairs xn_i . xn_j in one lane-dense MXU matmul.
    lin = jnp.dot(xn_ref[...], xnT_ref[...], preferred_element_type=jnp.float32)
    lin_sm = _masked_row_softmax(lin, m)

    # nonlinear ('s') fitness: score_lin(cat(x_i, x_j)) = (x_i.w1) + (x_j.w2 + b).
    # Both dot products hoisted to the wrapper (grid-invariant): only the
    # (TM,1)+(1,Np) broadcast add remains on the VPU.
    non_sm = _masked_row_softmax(_leaky_relu(acol_ref[...] + crow_ref[...]), m)

    # fitness_mode == 'both_c'
    fit = _masked_row_softmax(lin_sm * non_sm, m)
    fit_ref[...] = fit                       # (TM, Np) lane-dense store

    # Cluster_assignment: scatter(fitness, dst, reduce='mean') == column mean.
    sum_acc[...] += jnp.sum(fit, axis=0, keepdims=True)
    cnt_acc[...] += jnp.sum(mf, axis=0, keepdims=True)

    @pl.when(i == pl.num_programs(0) - 1)
    def _():
        cscore_ref[...] = sum_acc[...] / jnp.maximum(cnt_acc[...], 1.0)


# ---------------- Kernel 2: generic tiled matmul (used twice for StAS) ----------------
def _matmul_kernel(a_ref, b_ref, o_ref, acc_ref):
    @pl.when(pl.program_id(2) == 0)
    def _():
        acc_ref[...] = jnp.zeros_like(acc_ref)

    acc_ref[...] += jnp.dot(a_ref[...], b_ref[...], preferred_element_type=jnp.float32)

    @pl.when(pl.program_id(2) == pl.num_programs(2) - 1)
    def _():
        o_ref[...] = acc_ref[...]


def _pick_tile(dim, prefs=(512, 256, 128)):
    for p in prefs:
        if dim % p == 0:
            return p
    return dim  # padded dims are always 128-multiples


def _tiled_matmul(a, b):
    # StAS stages (A@S and S^T@(AS)).  Kept f32: value_E holds degree-like
    # integer sums that bf16 operands would round above 256.
    M, K = a.shape
    K2, N = b.shape
    assert K == K2
    tm, tn, tk = _pick_tile(M), _pick_tile(N), _pick_tile(K)
    return pl.pallas_call(
        _matmul_kernel,
        out_shape=jax.ShapeDtypeStruct((M, N), jnp.float32),
        grid_spec=pltpu.PrefetchScalarGridSpec(
            num_scalar_prefetch=0,
            grid=(M // tm, N // tn, K // tk),
            in_specs=[pl.BlockSpec((tm, tk), lambda i, j, k: (i, k)),
                      pl.BlockSpec((tk, tn), lambda i, j, k: (k, j))],
            out_specs=pl.BlockSpec((tm, tn), lambda i, j, k: (i, j)),
            scratch_shapes=[pltpu.VMEM((tm, tn), jnp.float32)]),
        compiler_params=pltpu.CompilerParams(
            dimension_semantics=("parallel", "parallel", "arbitrary"),
            vmem_limit_bytes=VMEM_LIMIT),
    )(a, b)


# ---------------- Kernel 3: Pool_nodes, pooling_mode='att' ----------------
# Dense layout: rows = clusters (kN), cols = source nodes (N).  Grid over cluster
# row tiles, independent -> "parallel".
def _pool_att_kernel(x_ref, arow_ref, ecol_ref, sval_ref, smask_ref, out_ref):
    m = smask_ref[...].astype(jnp.float32) > 0
    # pool_lin(cat(x_src, ego_c)) = (x_src.w1 + b) + (ego_c.w2): both dot
    # products hoisted to the wrapper; only the broadcast add remains.
    s = _leaky_relu(arow_ref[...] + ecol_ref[...])              # (TC, Np)
    att = _masked_row_softmax(s, m)                             # softmax over index_S[1]
    # F.dropout(p=0.0) == identity; x_j = x[src]*att*value_S, scatter-add over
    # clusters == one (TC, Np) @ (Np, Fp) MXU matmul.
    w = (att * sval_ref[...]).astype(x_ref.dtype)
    out_ref[...] = jnp.dot(w, x_ref[...], preferred_element_type=jnp.float32)


# ------------------------------ host-side graph glue ------------------------------
def generate_clusters_np(edge_index, num_hops, N):
    # TODO(synk): spspmm / unique / remove_self_loops are dynamic-shape sparse index
    # bookkeeping; done densely on host (pattern of A^k), values discarded as in torch.
    A = np.zeros((N, N), dtype=bool)
    A[edge_index[0], edge_index[1]] = True
    acc = A.copy()
    P = A.copy()
    for _ in range(2, num_hops + 1):
        P = (P.astype(np.int64) @ A.astype(np.int64)) > 0
        acc |= P
    np.fill_diagonal(acc, False)
    src, dst = np.nonzero(acc)
    return np.stack([src, dst], axis=0).astype(np.int32)


def select_clusters_np(edge_index, scores, N):
    src, dst = edge_index
    keep = src != dst
    src, dst = src[keep], dst[keep]
    all_idx = np.unique(src)
    del_idx = np.unique(src[scores[src] - scores[dst] < 0])
    return np.setdiff1d(all_idx, del_idx).astype(np.int32)


class AdaptivePoolingPallas:
    def __init__(self, in_size, cluster_range=1, drop_ratio=0.0, key=None):
        self.in_size = in_size
        self.cluster_range = cluster_range
        self.drop_ratio = drop_ratio
        key = jax.random.PRNGKey(0) if key is None else key
        k1, k2, k3, k4 = jax.random.split(key, 4)
        bound = 1.0 / np.sqrt(2 * in_size)
        # nn.Linear(2*in_size, 1) weights, stored as (2F, 1) + (1, 1) bias
        self.w_score = jax.random.uniform(k1, (2 * in_size, 1), jnp.float32, -bound, bound)
        self.b_score = jax.random.uniform(k2, (1, 1), jnp.float32, -bound, bound)
        self.w_pool = jax.random.uniform(k3, (2 * in_size, 1), jnp.float32, -bound, bound)
        self.b_pool = jax.random.uniform(k4, (1, 1), jnp.float32, -bound, bound)

    # -------- fitness + cluster scores (Pallas, dense lane-major layout) --------
    def _fitness_and_cluster_scores(self, x, cluster_index, N):
        F = x.shape[1]
        Np = _round_up(max(N, LANE), LANE)
        Fp = _round_up(max(F, LANE), LANE)
        TM = 256 if Np % 256 == 0 else 128       # 256-row MXU tiles when they divide Np

        # F.normalize(x, p=2, dim=-1) — feeds both the cosine and score_lin paths
        # (matches the torch reassignment for 'both_c').
        xn = x / jnp.maximum(jnp.sqrt(jnp.sum(x * x, axis=-1, keepdims=True)), 1e-12)

        # Hoisted, grid-invariant score_lin terms (tiny O(N*F) jnp ops):
        #   a_col[i] = xn_i . w1      (row / src term)
        #   c_row[j] = xn_j . w2 + b  (col / dst term, bias folded)
        a_col = jnp.zeros((Np, 1), jnp.float32).at[:N, 0].set(xn @ self.w_score[:F, 0])
        c_row = jnp.zeros((1, Np), jnp.float32).at[0, :N].set(
            xn @ self.w_score[F:, 0] + self.b_score[0, 0])

        xn_p = jnp.zeros((Np, Fp), MXU_DTYPE).at[:N, :F].set(xn.astype(MXU_DTYPE))
        xnT_p = xn_p.T                           # (Fp, Np) resident MXU RHS

        mask = np.zeros((Np, Np), np.int8)       # int8: 4x less DMA/VMEM than f32
        mask[cluster_index[0], cluster_index[1]] = 1

        fit_dense, cscore = pl.pallas_call(
            _fitness_kernel,
            out_shape=(jax.ShapeDtypeStruct((Np, Np), jnp.float32),
                       jax.ShapeDtypeStruct((1, Np), jnp.float32)),
            grid_spec=pltpu.PrefetchScalarGridSpec(
                num_scalar_prefetch=0,
                grid=(Np // TM,),
                in_specs=[
                    pl.BlockSpec((TM, Fp), lambda i: (i, 0)),    # xn row tile
                    pl.BlockSpec((Fp, Np), lambda i: (0, 0)),    # xn^T (resident)
                    pl.BlockSpec((TM, 1), lambda i: (i, 0)),     # hoisted xn.w1 rows
                    pl.BlockSpec((1, Np), lambda i: (0, 0)),     # hoisted xn.w2 + bias
                    pl.BlockSpec((TM, Np), lambda i: (i, 0)),    # int8 cluster-edge mask
                ],
                out_specs=(pl.BlockSpec((TM, Np), lambda i: (i, 0)),   # fitness rows
                           pl.BlockSpec((1, Np), lambda i: (0, 0))),   # cluster scores
                scratch_shapes=[pltpu.VMEM((1, Np), jnp.float32),      # column sums
                                pltpu.VMEM((1, Np), jnp.float32)]),    # column counts
            compiler_params=pltpu.CompilerParams(
                dimension_semantics=("arbitrary",),   # cscore accumulates across row tiles
                vmem_limit_bytes=VMEM_LIMIT),
        )(xn_p, xnT_p, a_col, c_row, jnp.asarray(mask))

        src = jnp.asarray(cluster_index[0])
        dst = jnp.asarray(cluster_index[1])
        fitness = fit_dense[src, dst]            # per-edge fitness, original edge order
        return fitness, cscore[0, :N]

    # -------- graph_connectivity (host index bookkeeping + Pallas tiled StAS) --------
    def _graph_connectivity(self, x, cluster_ids, edge_index, edge_weight,
                            cluster_index, score, N):
        mask_in = np.isin(cluster_index[1], cluster_ids)
        index_in = cluster_index[:, mask_in]
        value_in = score[mask_in].astype(np.float32)
        non_in = np.setdiff1d(np.arange(N, dtype=np.int32), np.unique(index_in))
        index_S = np.concatenate(
            [index_in,
             np.stack([cluster_ids, cluster_ids], axis=0),
             np.stack([non_in, non_in], axis=0)], axis=1).astype(np.int32)
        value_S = np.concatenate(
            [value_in, np.ones(index_S.shape[1] - value_in.shape[0], np.float32)])
        ego_ids = np.unique(index_S[1])
        kN = int(ego_ids.shape[0])
        n_idx = np.zeros(N, dtype=np.int32)
        n_idx[ego_ids] = np.arange(kN, dtype=np.int32)
        index_S = index_S.copy()
        index_S[1] = n_idx[index_S[1]]
        ego_x = x[jnp.asarray(ego_ids)]

        src, dst = edge_index
        value_A = (np.ones(src.shape[0], np.float32) if edge_weight is None
                   else np.asarray(edge_weight, np.float32))

        Np = _round_up(max(N, LANE), LANE)
        kNp = _round_up(max(kN, LANE), LANE)
        A = np.zeros((Np, Np), np.float32)
        np.add.at(A, (src, dst), value_A)                 # coalesce == scatter-add
        S = np.zeros((Np, kNp), np.float32)
        np.add.at(S, (index_S[0], index_S[1]), value_S)
        St = np.ascontiguousarray(S.T)                    # feed S^T: both stages (M,K)@(K,N)

        B = _tiled_matmul(jnp.asarray(A), jnp.asarray(S))   # A @ S       (Np, kNp)
        E_full = _tiled_matmul(jnp.asarray(St), B)          # S^T @ (AS)  (kNp, kNp)
        E_dense = np.array(E_full[:kN, :kN])

        # add_remaining_self_loops(fill_value=1.0)
        diag = np.diagonal(E_dense).copy()
        E_dense[np.arange(kN), np.arange(kN)] = np.where(diag == 0.0, 1.0, diag)
        er, ec = np.nonzero(E_dense)
        index_E = np.stack([er, ec], axis=0).astype(np.int32)
        value_E = E_dense[er, ec].astype(np.float32)
        return index_E, value_E, index_S, value_S, ego_x, kN

    # -------- Pool_nodes, 'att' (Pallas, dense (kN, N) layout) --------
    def _pool_nodes(self, x, ego_x, index_S, value_S, kN):
        N, F = x.shape
        Np = _round_up(max(N, LANE), LANE)
        Fp = _round_up(max(F, LANE), LANE)
        kNp = _round_up(max(kN, LANE), LANE)
        TC = 256 if kNp % 256 == 0 else 128

        x_p = jnp.zeros((Np, Fp), MXU_DTYPE).at[:N, :F].set(x.astype(MXU_DTYPE))

        # Hoisted, grid-invariant pool_lin terms:
        #   a_row[j] = x_j . w1 + b   (per source node, bias folded)
        #   e_col[c] = ego_c . w2     (per cluster)
        a_row = jnp.zeros((1, Np), jnp.float32).at[0, :N].set(
            x @ self.w_pool[:F, 0] + self.b_pool[0, 0])
        e_col = jnp.zeros((kNp, 1), jnp.float32).at[:kN, 0].set(ego_x @ self.w_pool[F:, 0])

        sval = np.zeros((kNp, Np), np.float32)    # value_S at (cluster, src) — pairs unique
        smask = np.zeros((kNp, Np), np.int8)
        sval[index_S[1], index_S[0]] = value_S
        smask[index_S[1], index_S[0]] = 1

        pooled = pl.pallas_call(
            _pool_att_kernel,
            out_shape=jax.ShapeDtypeStruct((kNp, Fp), jnp.float32),
            grid_spec=pltpu.PrefetchScalarGridSpec(
                num_scalar_prefetch=0,
                grid=(kNp // TC,),
                in_specs=[
                    pl.BlockSpec((Np, Fp), lambda i: (0, 0)),    # x (resident MXU RHS)
                    pl.BlockSpec((1, Np), lambda i: (0, 0)),     # hoisted x.w1 + bias
                    pl.BlockSpec((TC, 1), lambda i: (i, 0)),     # hoisted ego.w2 rows
                    pl.BlockSpec((TC, Np), lambda i: (i, 0)),    # value_S rows
                    pl.BlockSpec((TC, Np), lambda i: (i, 0)),    # int8 mask rows
                ],
                out_specs=pl.BlockSpec((TC, Fp), lambda i: (i, 0))),
            compiler_params=pltpu.CompilerParams(
                dimension_semantics=("parallel",),    # cluster tiles independent
                vmem_limit_bytes=VMEM_LIMIT),
        )(x_p, a_row, e_col, jnp.asarray(sval), jnp.asarray(smask))
        return pooled[:kN, :F]

    # -------- forward --------
    def __call__(self, embedding, edge_index, edge_weight=None):
        N = embedding.shape[0]
        edge_index = np.asarray(edge_index, np.int32)
        cluster_index = generate_clusters_np(edge_index, self.cluster_range, N)
        fitness, cluster_scores = self._fitness_and_cluster_scores(
            embedding, cluster_index, N)
        cluster_ids = select_clusters_np(edge_index, np.asarray(cluster_scores), N)
        index_E, value_E, index_S, value_S, ego_x, kN = self._graph_connectivity(
            embedding, cluster_ids, edge_index, edge_weight, cluster_index,
            np.asarray(fitness), N)
        new_x = self._pool_nodes(embedding, ego_x, index_S, value_S, kN)
        return new_x, index_E, value_E, index_S, value_S, fitness


if __name__ == "__main__":
    key = jax.random.PRNGKey(0)
    kx, kp = jax.random.split(key)

    N, F = 8, 16
    embedding = jax.random.normal(kx, (N, F), dtype=jnp.float32)

    # small symmetric graph: ring + chords + one self loop (stripped by the model)
    und = [(0, 1), (1, 2), (2, 3), (3, 4), (4, 5), (5, 6), (6, 7), (7, 0),
           (0, 4), (2, 6), (1, 5)]
    src = [a for a, b in und] + [b for a, b in und] + [3]
    dst = [b for a, b in und] + [a for a, b in und] + [3]
    edge_index = np.stack([np.array(src), np.array(dst)], axis=0).astype(np.int32)

    model = AdaptivePoolingPallas(in_size=F, cluster_range=1, key=kp)
    new_x, index_E, value_E, index_S, value_S, fitness = model(
        embedding, edge_index, edge_weight=None)

    jax.block_until_ready(new_x)
    jax.block_until_ready(fitness)
    print("KERNEL_OK")
</pallas_src>

<mosaic_0001>
module attributes {stable_mosaic.version = 11 : i64} {
  func.func @_fitness_kernel(%arg0: i32, %arg1: memref<128x128xf32, #tpu.memory_space<vmem>>, %arg2: memref<128x128xf32, #tpu.memory_space<vmem>>, %arg3: memref<128x1xf32, #tpu.memory_space<vmem>>, %arg4: memref<1x128xf32, #tpu.memory_space<vmem>>, %arg5: memref<128x128xi8, #tpu.memory_space<vmem>>, %arg6: memref<128x128xf32, #tpu.memory_space<vmem>>, %arg7: memref<1x128xf32, #tpu.memory_space<vmem>>, %arg8: memref<1x128xf32, #tpu.memory_space<vmem>>, %arg9: memref<1x128xf32, #tpu.memory_space<vmem>>) attributes {dimension_semantics = [#tpu.dimension_semantics<arbitrary>], iteration_bounds = array<i64: 1>, scalar_prefetch = 0 : i64, scratch_operands = 2 : i64, tpu.core_type = #tpu.core_type<tc>, window_params = [{transform_indices = @transform_0, window_bounds = array<i64: 128, 128>}, {pipeline_mode = #tpu.pipeline_mode<synchronous>, transform_indices = @transform_1, window_bounds = array<i64: 128, 128>}, {transform_indices = @transform_2, window_bounds = array<i64: 128, 1>}, {pipeline_mode = #tpu.pipeline_mode<synchronous>, transform_indices = @transform_3, window_bounds = array<i64: 1, 128>}, {transform_indices = @transform_4, window_bounds = array<i64: 128, 128>}, {transform_indices = @transform_5, window_bounds = array<i64: 128, 128>}, {pipeline_mode = #tpu.pipeline_mode<synchronous>, transform_indices = @transform_6, window_bounds = array<i64: 1, 128>}]} {
    %c0_i32 = arith.constant 0 : i32
    %0 = arith.cmpi eq, %arg0, %c0_i32 : i32
    %1 = arith.extui %0 : i1 to i32
    %c0_i32_0 = arith.constant 0 : i32
    %2 = arith.cmpi ne, %1, %c0_i32_0 : i32
    scf.if %2 {
      %cst_42 = arith.constant 0.000000e+00 : f32
      %83 = vector.broadcast %cst_42 : f32 to vector<1x128xf32>
      %c0_43 = arith.constant 0 : index
      %c0_44 = arith.constant 0 : index
      %84 = vector.load %arg8[%c0_43, %c0_44] : memref<1x128xf32, #tpu.memory_space<vmem>>, vector<1x128xf32>
      tpu.vector_store %arg8[%c0_43, %c0_44], %83 {strides = array<i32>} : memref<1x128xf32, #tpu.memory_space<vmem>>, vector<1x128xf32>,
      %cst_45 = arith.constant 0.000000e+00 : f32
      %85 = vector.broadcast %cst_45 : f32 to vector<1x128xf32>
      %c0_46 = arith.constant 0 : index
      %c0_47 = arith.constant 0 : index
      %86 = vector.load %arg9[%c0_46, %c0_47] : memref<1x128xf32, #tpu.memory_space<vmem>>, vector<1x128xf32>
      tpu.vector_store %arg9[%c0_46, %c0_47], %85 {strides = array<i32>} : memref<1x128xf32, #tpu.memory_space<vmem>>, vector<1x128xf32>,
    } else {
    }
    %c0 = arith.constant 0 : index
    %c0_1 = arith.constant 0 : index
    %3 = vector.load %arg5[%c0, %c0_1] : memref<128x128xi8, #tpu.memory_space<vmem>>, vector<128x128xi8>
    %4 = arith.sitofp %3 : vector<128x128xi8> to vector<128x128xf32>
    %cst = arith.constant 0.000000e+00 : f32
    %5 = vector.broadcast %cst : f32 to vector<128x128xf32>
    %6 = arith.cmpf ogt, %4, %5 : vector<128x128xf32>
    %c0_2 = arith.constant 0 : index
    %c0_3 = arith.constant 0 : index
    %7 = vector.load %arg1[%c0_2, %c0_3] : memref<128x128xf32, #tpu.memory_space<vmem>>, vector<128x128xf32>
    %c0_4 = arith.constant 0 : index
    %c0_5 = arith.constant 0 : index
    %8 = vector.load %arg2[%c0_4, %c0_5] : memref<128x128xf32, #tpu.memory_space<vmem>>, vector<128x128xf32>
    %cst_6 = arith.constant dense<0.000000e+00> : vector<128x128xf32>
    %9 = tpu.matmul %7, %8, %cst_6 {dimension_numbers = #tpu.dot_dimension_numbers<[1], [0], [0], [1], [0, 0, 1, 1], [], []>} : vector<128x128xf32>, vector<128x128xf32>, vector<128x128xf32> -> vector<128x128xf32>
    %cst_7 = arith.constant -1.000000e+30 : f32
    %10 = vector.broadcast %cst_7 : f32 to vector<128x128xf32>
    %11 = arith.select %6, %9, %10 : vector<128x128xi1>, vector<128x128xf32>
    %cst_8 = arith.constant dense<0xFF800000> : vector<128xf32>
    %12 = vector.multi_reduction <maximumf>, %11, %cst_8 [1] : vector<128x128xf32> to vector<128xf32>
    %13 = vector.shape_cast %12 : vector<128xf32> to vector<128x1xf32>
    %14 = vector.broadcast %13 : vector<128x1xf32> to vector<128x128xf32>
    %15 = arith.subf %11, %14 : vector<128x128xf32>
    %16 = math.exp %15 : vector<128x128xf32>
    %cst_9 = arith.constant 0.000000e+00 : f32
    %17 = vector.broadcast %cst_9 : f32 to vector<128x128xf32>
    %18 = arith.select %6, %16, %17 : vector<128x128xi1>, vector<128x128xf32>
    %cst_10 = arith.constant dense<0.000000e+00> : vector<128xf32>
    %19 = vector.multi_reduction <add>, %18, %cst_10 [1] : vector<128x128xf32> to vector<128xf32>
    %20 = vector.shape_cast %19 : vector<128xf32> to vector<128x1xf32>
    %cst_11 = arith.constant 1.000000e-16 : f32
    %21 = vector.broadcast %cst_11 : f32 to vector<128x1xf32>
    %22 = arith.addf %20, %21 : vector<128x1xf32>
    %23 = tpu.reciprocal %22 {approx = true} : vector<128x1xf32> -> vector<128x1xf32>
    %24 = vector.broadcast %23 : vector<128x1xf32> to vector<128x128xf32>
    %25 = arith.mulf %18, %24 : vector<128x128xf32>
    %c0_12 = arith.constant 0 : index
    %c0_13 = arith.constant 0 : index
    %26 = vector.load %arg3[%c0_12, %c0_13] : memref<128x1xf32, #tpu.memory_space<vmem>>, vector<128x1xf32>
    %c0_14 = arith.constant 0 : index
    %c0_15 = arith.constant 0 : index
    %27 = vector.load %arg4[%c0_14, %c0_15] : memref<1x128xf32, #tpu.memory_space<vmem>>, vector<1x128xf32>
    %28 = vector.broadcast %26 : vector<128x1xf32> to vector<128x128xf32>
    %29 = vector.broadcast %27 : vector<1x128xf32> to vector<128x128xf32>
    %30 = arith.addf %28, %29 : vector<128x128xf32>
    %cst_16 = arith.constant 0.000000e+00 : f32
    %31 = vector.broadcast %cst_16 : f32 to vector<128x128xf32>
    %32 = arith.cmpf oge, %30, %31 : vector<128x128xf32>
    %cst_17 = arith.constant 0.00999999977 : f32
    %33 = vector.broadcast %cst_17 : f32 to vector<128x128xf32>
    %34 = arith.mulf %33, %30 : vector<128x128xf32>
    %35 = arith.select %32, %30, %34 : vector<128x128xi1>, vector<128x128xf32>
    %cst_18 = arith.constant -1.000000e+30 : f32
    %36 = vector.broadcast %cst_18 : f32 to vector<128x128xf32>
    %37 = arith.select %6, %35, %36 : vector<128x128xi1>, vector<128x128xf32>
    %cst_19 = arith.constant dense<0xFF800000> : vector<128xf32>
    %38 = vector.multi_reduction <maximumf>, %37, %cst_19 [1] : vector<128x128xf32> to vector<128xf32>
    %39 = vector.shape_cast %38 : vector<128xf32> to vector<128x1xf32>
    %40 = vector.broadcast %39 : vector<128x1xf32> to vector<128x128xf32>
    %41 = arith.subf %37, %40 : vector<128x128xf32>
    %42 = math.exp %41 : vector<128x128xf32>
    %cst_20 = arith.constant 0.000000e+00 : f32
    %43 = vector.broadcast %cst_20 : f32 to vector<128x128xf32>
    %44 = arith.select %6, %42, %43 : vector<128x128xi1>, vector<128x128xf32>
    %cst_21 = arith.constant dense<0.000000e+00> : vector<128xf32>
    %45 = vector.multi_reduction <add>, %44, %cst_21 [1] : vector<128x128xf32> to vector<128xf32>
    %46 = vector.shape_cast %45 : vector<128xf32> to vector<128x1xf32>
    %cst_22 = arith.constant 1.000000e-16 : f32
    %47 = vector.broadcast %cst_22 : f32 to vector<128x1xf32>
    %48 = arith.addf %46, %47 : vector<128x1xf32>
    %49 = tpu.reciprocal %48 {approx = true} : vector<128x1xf32> -> vector<128x1xf32>
    %50 = vector.broadcast %49 : vector<128x1xf32> to vector<128x128xf32>
    %51 = arith.mulf %44, %50 : vector<128x128xf32>
    %52 = arith.mulf %25, %51 : vector<128x128xf32>
    %cst_23 = arith.constant -1.000000e+30 : f32
    %53 = vector.broadcast %cst_23 : f32 to vector<128x128xf32>
    %54 = arith.select %6, %52, %53 : vector<128x128xi1>, vector<128x128xf32>
    %cst_24 = arith.constant dense<0xFF800000> : vector<128xf32>
    %55 = vector.multi_reduction <maximumf>, %54, %cst_24 [1] : vector<128x128xf32> to vector<128xf32>
    %56 = vector.shape_cast %55 : vector<128xf32> to vector<128x1xf32>
    %57 = vector.broadcast %56 : vector<128x1xf32> to vector<128x128xf32>
    %58 = arith.subf %54, %57 : vector<128x128xf32>
    %59 = math.exp %58 : vector<128x128xf32>
    %cst_25 = arith.constant 0.000000e+00 : f32
    %60 = vector.broadcast %cst_25 : f32 to vector<128x128xf32>
    %61 = arith.select %6, %59, %60 : vector<128x128xi1>, vector<128x128xf32>
    %cst_26 = arith.constant dense<0.000000e+00> : vector<128xf32>
    %62 = vector.multi_reduction <add>, %61, %cst_26 [1] : vector<128x128xf32> to vector<128xf32>
    %63 = vector.shape_cast %62 : vector<128xf32> to vector<128x1xf32>
    %cst_27 = arith.constant 1.000000e-16 : f32
    %64 = vector.broadcast %cst_27 : f32 to vector<128x1xf32>
    %65 = arith.addf %63, %64 : vector<128x1xf32>
    %66 = tpu.reciprocal %65 {approx = true} : vector<128x1xf32> -> vector<128x1xf32>
    %67 = vector.broadcast %66 : vector<128x1xf32> to vector<128x128xf32>
    %68 = arith.mulf %61, %67 : vector<128x128xf32>
    %c0_28 = arith.constant 0 : index
    %c0_29 = arith.constant 0 : index
    %69 = vector.load %arg6[%c0_28, %c0_29] : memref<128x128xf32, #tpu.memory_space<vmem>>, vector<128x128xf32>
    tpu.vector_store %arg6[%c0_28, %c0_29], %68 {strides = array<i32>} : memref<128x128xf32, #tpu.memory_space<vmem>>, vector<128x128xf32>,
    %c0_30 = arith.constant 0 : index
    %c0_31 = arith.constant 0 : index
    %70 = vector.load %arg8[%c0_30, %c0_31] : memref<1x128xf32, #tpu.memory_space<vmem>>, vector<1x128xf32>
    %cst_32 = arith.constant dense<0.000000e+00> : vector<128xf32>
    %71 = vector.multi_reduction <add>, %68, %cst_32 [0] : vector<128x128xf32> to vector<128xf32>
    %72 = vector.shape_cast %71 : vector<128xf32> to vector<1x128xf32>
    %73 = arith.addf %70, %72 : vector<1x128xf32>
    %c0_33 = arith.constant 0 : index
    %c0_34 = arith.constant 0 : index
    %74 = vector.load %arg8[%c0_33, %c0_34] : memref<1x128xf32, #tpu.memory_space<vmem>>, vector<1x128xf32>
    tpu.vector_store %arg8[%c0_33, %c0_34], %73 {strides = array<i32>} : memref<1x128xf32, #tpu.memory_space<vmem>>, vector<1x128xf32>,
    %c0_35 = arith.constant 0 : index
    %c0_36 = arith.constant 0 : index
    %75 = vector.load %arg9[%c0_35, %c0_36] : memref<1x128xf32, #tpu.memory_space<vmem>>, vector<1x128xf32>
    %cst_37 = arith.constant dense<0.000000e+00> : vector<128xf32>
    %76 = vector.multi_reduction <add>, %4, %cst_37 [0] : vector<128x128xf32> to vector<128xf32>
    %77 = vector.shape_cast %76 : vector<128xf32> to vector<1x128xf32>
    %78 = arith.addf %75, %77 : vector<1x128xf32>
    %c0_38 = arith.constant 0 : index
    %c0_39 = arith.constant 0 : index
    %79 = vector.load %arg9[%c0_38, %c0_39] : memref<1x128xf32, #tpu.memory_space<vmem>>, vector<1x128xf32>
    tpu.vector_store %arg9[%c0_38, %c0_39], %78 {strides = array<i32>} : memref<1x128xf32, #tpu.memory_space<vmem>>, vector<1x128xf32>,
    %c0_i32_40 = arith.constant 0 : i32
    %80 = arith.cmpi eq, %arg0, %c0_i32_40 : i32
    %81 = arith.extui %80 : i1 to i32
    %c0_i32_41 = arith.constant 0 : i32
    %82 = arith.cmpi ne, %81, %c0_i32_41 : i32
    scf.if %82 {
      %c0_42 = arith.constant 0 : index
      %c0_43 = arith.constant 0 : index
      %83 = vector.load %arg8[%c0_42, %c0_43] : memref<1x128xf32, #tpu.memory_space<vmem>>, vector<1x128xf32>
      %c0_44 = arith.constant 0 : index
      %c0_45 = arith.constant 0 : index
      %84 = vector.load %arg9[%c0_44, %c0_45] : memref<1x128xf32, #tpu.memory_space<vmem>>, vector<1x128xf32>
      %cst_46 = arith.constant 1.000000e+00 : f32
      %85 = vector.broadcast %cst_46 : f32 to vector<1x128xf32>
      %86 = arith.maximumf %84, %85 : vector<1x128xf32>
      %87 = arith.divf %83, %86 : vector<1x128xf32>
      %c0_47 = arith.constant 0 : index
      %c0_48 = arith.constant 0 : index
      %88 = vector.load %arg7[%c0_47, %c0_48] : memref<1x128xf32, #tpu.memory_space<vmem>>, vector<1x128xf32>
      tpu.vector_store %arg7[%c0_47, %c0_48], %87 {strides = array<i32>} : memref<1x128xf32, #tpu.memory_space<vmem>>, vector<1x128xf32>,
    } else {
    }
    return
  }
  func.func @transform_0(%arg0: i32) -> (i32, i32) {
    %c0_i32 = arith.constant 0 : i32
    %c0_i32_0 = arith.constant 0 : i32
    return %arg0, %c0_i32 : i32, i32
  }
  func.func @transform_1(%arg0: i32) -> (i32, i32) {
    %c0_i32 = arith.constant 0 : i32
    %c0_i32_0 = arith.constant 0 : i32
    %c0_i32_1 = arith.constant 0 : i32
    return %c0_i32, %c0_i32_0 : i32, i32
  }
  func.func @transform_2(%arg0: i32) -> (i32, i32) {
    %c0_i32 = arith.constant 0 : i32
    %c0_i32_0 = arith.constant 0 : i32
    return %arg0, %c0_i32 : i32, i32
  }
  func.func @transform_3(%arg0: i32) -> (i32, i32) {
    %c0_i32 = arith.constant 0 : i32
    %c0_i32_0 = arith.constant 0 : i32
    %c0_i32_1 = arith.constant 0 : i32
    return %c0_i32, %c0_i32_0 : i32, i32
  }
  func.func @transform_4(%arg0: i32) -> (i32, i32) {
    %c0_i32 = arith.constant 0 : i32
    %c0_i32_0 = arith.constant 0 : i32
    return %arg0, %c0_i32 : i32, i32
  }
  func.func @transform_5(%arg0: i32) -> (i32, i32) {
    %c0_i32 = arith.constant 0 : i32
    %c0_i32_0 = arith.constant 0 : i32
    return %arg0, %c0_i32 : i32, i32
  }
  func.func @transform_6(%arg0: i32) -> (i32, i32) {
    %c0_i32 = arith.constant 0 : i32
    %c0_i32_0 = arith.constant 0 : i32
    %c0_i32_1 = arith.constant 0 : i32
    return %c0_i32, %c0_i32_0 : i32, i32
  }
}

</mosaic_0001>

<bundles_post_ra>
// kernel: tpu_custom_call.1
= control target key start
LH: loop header
LB: loop body
LE: loop exit
PB: predicated region body
PF: predicated region fallthrough
CT: control target
= control target key end

     0   :  { %12 = vsyncpa [#allocation5], 0  ;;  %s2304_s0 = inlined_call_operand.vmem [shape: f32[128,128], index: 0, kind: input, shape index: {}]   ;;  %s2305_s1 = inlined_call_operand.hbm [shape: f32[128,128], index: 1, kind: input, shape index: {}]   ;;  %s2306_s2 = inlined_call_operand.vmem [shape: f32[128,1], index: 2, kind: input, shape index: {}]   ;;  %s2307_s3 = inlined_call_operand.vmem [shape: f32[1,128], index: 3, kind: input, shape index: {}]   ;;  %s2308_s4 = inlined_call_operand.hbm [shape: s8[128,128], index: 4, kind: input, shape index: {}]   ;;  %s2309_s5 = inlined_call_operand.hbm [shape: f32[128,128], index: 5, kind: output, shape index: {0}]   ;;  %s2310_s6 = inlined_call_operand.hbm [shape: f32[1,128], index: 6, kind: output, shape index: {1}]  }
   0x1   :  { %13 = vsyncpa [#allocation8], 0 }
   0x2   :  { %14 = vsyncpa [#allocation6], 0 }
   0x3   :  { %15 = vsyncpa [#allocation11], 0  ;;  %s22_s23 = sshll.u32 %s2305_s1, 4  ;;  %s1447_s24 = smov [#allocation4]   ;;  %s23_s23 = int_to_ptr.hbm [resolvable:$true] %s22_s23 }
   0x4   :  { %s24_s25 = sshll.u32 %s1447_s24, 4  ;;  %s39_s28 = sshll.u32 %s2308_s4, 4  ;;  %s25_s25 = int_to_ptr.vmem [resolvable:$true] %s24_s25  ;;  %s40_s28 = int_to_ptr.hbm [resolvable:$true] %s39_s28 }
   0x5   :  { %s1448_s29 = smov 128   ;;  %s1449_s30 = smov 8  }
   0x6   :  { %30 = dma.hbm_to_vmem [thread:$0]  %s23_s23, 2048, %s25_s25, [#allocation5], %s1448_s29, %s1448_s29, %s1449_s30  }
   0x7   :  { %s1450_s7 = smov [#allocation7]  }
   0x8   :  { %s41_s8 = sshll.u32 %s1450_s7, 4  ;;  %s42_s8 = int_to_ptr.vmem [resolvable:$true] %s41_s8 }
   0x9   :  { %47 = dma.hbm_to_vmem [thread:$0]  %s40_s28, 512, %s42_s8, [#allocation8], %s1448_s29, %s1448_s29, %s1449_s30  }
   0xa   :  { %1439 = dma.done.wait [#allocation5], 2048  }
   0xb   :  { %1440 = vsyncadd [#allocation5], 4294965248 }
   0xc   :  { %1441 = dma.done.wait [#allocation8], 512  }
   0xd   :  { %1442 = vsyncadd [#allocation8], 4294966784  ;;  %v1451_v0 = vmov 0   ;;  %v405_v1 = vld [vmem:[%s2306_s2 + $0x10] sm:$0xff]  ;;  %v404_v2 = vld [vmem:[%s2306_s2 + $0x8] sm:$0xff]  ;;  %s1059_s26 = sshll.u32 %s2309_s5, 4  ;;  %s1060_s26 = int_to_ptr.hbm [resolvable:$true] %s1059_s26 }
   0xe   :  { %1147 = vset.pattern.permute.xlu1 %v1451_v0  ;;  %1146 = vset.pattern.permute.xlu0 %v1451_v0  ;;  %v403_v3 = vld [vmem:[%s2306_s2] sm:$0xff]  ;;  %v144_v5 = vld [vmem:[#allocation4 + $0x70] sm:$0xff]  ;;  %v143_v6 = vld [vmem:[#allocation4 + $0x68] sm:$0xff]  ;;  %s1454_s5 = smov [#allocation10]   ;;  %s1073_s28 = sshll.u32 %s2310_s6, 4  ;;  %s1074_s28 = int_to_ptr.hbm [resolvable:$true] %s1073_s28 }
   0xf   :  { %1145 = vset.pattern.permute.xlu2 %v1451_v0  ;;  %432 = vperm.xlu1 %1147, %v405_v1   ;;  %v145_v4 = vld [vmem:[#allocation4 + $0x78] sm:$0xff]  ;;  %v142_v7 = vld [vmem:[#allocation4 + $0x60] sm:$0xff]  ;;  %v140_v12 = vld [vmem:[#allocation4 + $0x50] sm:$0xff] }
  0x10   :  { %427 = vperm.xlu0 %1146, %v404_v2   ;;  %422 = vperm.xlu2 %1145, %v403_v3   ;;  %v408_v8 = vld [vmem:[%s2306_s2 + $0x28] sm:$0xff]  ;;  %v411_v9 = vld [vmem:[%s2306_s2 + $0x40] sm:$0xff]  ;;  %v406_v10 = vld [vmem:[%s2306_s2 + $0x18] sm:$0xff] }
  0x11   :  { %1091 = vmatpush.msra.mxu3 %v145_v4  ;;  %146 = vmatpush.msra.mxu0 %v145_v4  ;;  %v141_v11 = vld [vmem:[#allocation4 + $0x58] sm:$0xff]  ;;  %v139_v13 = vld [vmem:[#allocation4 + $0x48] sm:$0xff]  ;;  %v138_v14 = vld [vmem:[#allocation4 + $0x40] sm:$0xff] }
  0x12   :  { %1089 = vmatpush.msra.mxu1 %v145_v4  ;;  %1090 = vmatpush.msra.mxu2 %v145_v4  ;;  %v410_v15 = vld [vmem:[%s2306_s2 + $0x38] sm:$0xff]  ;;  %v407_v17 = vld [vmem:[%s2306_s2 + $0x20] sm:$0xff]  ;;  %v135_v20 = vld [vmem:[#allocation4 + $0x28] sm:$0xff] }
  0x13   :  { %1094 = vmatpush.msra.mxu3 %v144_v5  ;;  %147 = vmatpush.msra.mxu0 %v144_v5  ;;  %v414_v16 = vld [vmem:[%s2306_s2 + $0x58] sm:$0xff]  ;;  %v134_v21 = vld [vmem:[#allocation4 + $0x20] sm:$0xff]  ;;  %v413_v22 = vld [vmem:[%s2306_s2 + $0x50] sm:$0xff] }
  0x14   :  { %1092 = vmatpush.msra.mxu1 %v144_v5  ;;  %1093 = vmatpush.msra.mxu2 %v144_v5  ;;  %v137_v18 = vld [vmem:[#allocation4 + $0x38] sm:$0xff]  ;;  %v136_v19 = vld [vmem:[#allocation4 + $0x30] sm:$0xff]  ;;  %v131_v27 = vld [vmem:[#allocation4 + $0x8] sm:$0xff] }
  0x15   :  { %1097 = vmatpush.msra.mxu3 %v143_v6  ;;  %148 = vmatpush.msra.mxu0 %v143_v6  ;;  %v417_v23 = vld [vmem:[%s2306_s2 + $0x70] sm:$0xff]  ;;  %v133_v25 = vld [vmem:[#allocation4 + $0x18] sm:$0xff]  ;;  %v130_v28 = vld [vmem:[#allocation4] sm:$0xff] }
  0x16   :  { %1095 = vmatpush.msra.mxu1 %v143_v6  ;;  %1096 = vmatpush.msra.mxu2 %v143_v6  ;;  %v409_v24 = vld [vmem:[%s2306_s2 + $0x30] sm:$0xff]  ;;  %v126_v29 = vld [vmem:[%s2304_s0 + $0x60] sm:$0xff]  ;;  %v416_v30 = vld [vmem:[%s2306_s2 + $0x68] sm:$0xff] }
  0x17   :  { %1100 = vmatpush.msra.mxu3 %v142_v7  ;;  %447 = vperm.xlu1 %1147, %v408_v8   ;;  %v132_v26 = vld [vmem:[#allocation4 + $0x10] sm:$0xff]  ;;  %v412_v31 = vld [vmem:[%s2306_s2 + $0x48] sm:$0xff]  ;;  %v114_v32 = vld [vmem:[%s2304_s0] sm:$0xff] }
  0x18   :  { %462 = vperm.xlu0 %1146, %v411_v9   ;;  %437 = vperm.xlu2 %1145, %v406_v10   ;;  %v118_v33 = vld [vmem:[%s2304_s0 + $0x20] sm:$0xff]  ;;  %v127_v35 = vld [vmem:[%s2304_s0 + $0x68] sm:$0xff]  ;;  %v128_v40 = vld [vmem:[%s2304_s0 + $0x70] sm:$0xff] }
  0x19   :  { %1103 = vmatpush.msra.mxu3 %v141_v11  ;;  %149 = vmatpush.msra.mxu0 %v142_v7  ;;  %v122_v34 = vld [vmem:[%s2304_s0 + $0x40] sm:$0xff]  ;;  %v115_v37 = vld [vmem:[%s2304_s0 + $0x8] sm:$0xff]  ;;  %v418_v41 = vld [vmem:[%s2306_s2 + $0x78] sm:$0xff] }
  0x1a   :  { %1098 = vmatpush.msra.mxu1 %v142_v7  ;;  %1099 = vmatpush.msra.mxu2 %v142_v7  ;;  %v415_v36 = vld [vmem:[%s2306_s2 + $0x60] sm:$0xff]  ;;  %v119_v38 = vld [vmem:[%s2304_s0 + $0x28] sm:$0xff]  ;;  %v116_v42 = vld [vmem:[%s2304_s0 + $0x10] sm:$0xff] }
  0x1b   :  { %1106 = vmatpush.msra.mxu3 %v140_v12  ;;  %150 = vmatpush.msra.mxu0 %v141_v11  ;;  %v123_v39 = vld [vmem:[%s2304_s0 + $0x48] sm:$0xff]  ;;  %v120_v43 = vld [vmem:[%s2304_s0 + $0x30] sm:$0xff]  ;;  %v129_v45 = vld [vmem:[%s2304_s0 + $0x78] sm:$0xff] }
  0x1c   :  { %1101 = vmatpush.msra.mxu1 %v141_v11  ;;  %1102 = vmatpush.msra.mxu2 %v141_v11  ;;  %v124_v44 = vld [vmem:[%s2304_s0 + $0x50] sm:$0xff]  ;;  %v117_v46 = vld [vmem:[%s2304_s0 + $0x18] sm:$0xff]  ;;  %v62_v49 = vld [vmem:[#allocation7] sm:$0xff] }
  0x1d   :  { %1109 = vmatpush.msra.mxu3 %v139_v13  ;;  %151 = vmatpush.msra.mxu0 %v140_v12  ;;  %v121_v47 = vld [vmem:[%s2304_s0 + $0x38] sm:$0xff]  ;;  %v66_v50 = vunpack.c.0.s8 %v62_v49  ;;  %v1601_v51 = vld [vmem:[%s2307_s3] ss:$0 sm:$0xff]  ;;  %v68_v52 = vunpack.c.2.s8 %v62_v49  ;;  %v67_v53 = vunpack.c.1.s8 %v62_v49  ;;  %v63_v57 = vld [vmem:[#allocation7 + $0x8] sm:$0xff]  ;;  %v69_v59 = vunpack.c.3.s8 %v62_v49 }
  0x1e   :  { %1104 = vmatpush.msra.mxu1 %v140_v12  ;;  %1105 = vmatpush.msra.mxu2 %v140_v12  ;;  %v125_v48 = vld [vmem:[%s2304_s0 + $0x58] sm:$0xff]  ;;  %v70_v0 = vunpack.c.0.s8 %v63_v57  ;;  %v71_v3 = vunpack.c.1.s8 %v63_v57  ;;  %v72_v9 = vunpack.c.2.s8 %v63_v57  ;;  %s1453_s0 = smov [#allocation9]  }
  0x1f   :  { %1112 = vmatpush.msra.mxu3 %v138_v14  ;;  %152 = vmatpush.msra.mxu0 %v139_v13  ;;  %v1603_v54 = vcvt.s32.f32 %v66_v50  ;;  %v1605_v55 = vcvt.s32.f32 %v67_v53  ;;  %v1608_v60 = vcvt.s32.f32 %v68_v52  ;;  %v1614_v2 = vcvt.s32.f32 %v69_v59  ;;  %s1057_s3 = sshll.u32 %s1453_s0, 4  ;;  %s1058_s3 = int_to_ptr.vmem [resolvable:$true] %s1057_s3 }
  0x20   :  { %1107 = vmatpush.msra.mxu1 %v139_v13  ;;  %457 = vperm.xlu1 %1147, %v410_v15   ;;  %v1621_v5 = vcvt.s32.f32 %v70_v0  ;;  %v1626_v11 = vcvt.s32.f32 %v71_v3 }
  0x21   :  { %477 = vperm.xlu0 %1146, %v414_v16   ;;  %442 = vperm.xlu2 %1145, %v407_v17   ;;  %v1008_v61 = vadd.f32 %v1605_v55, %v1603_v54  ;;  %vm98_vm0 = vcmp.gt.f32.partialorder %v1603_v54, 0.0  ;;  %vm2312_vm2 = vcmp.gt.f32.partialorder %v1614_v2, 0.0  ;;  %v1630_v16 = vcvt.s32.f32 %v72_v9 }
  0x22   :  { %1115 = vmatpush.msra.mxu3 %v137_v18  ;;  %1108 = vmatpush.msra.mxu2 %v139_v13  ;;  %v73_v17 = vunpack.c.3.s8 %v63_v57  ;;  %vm100_vm4 = vcmp.gt.f32.partialorder %v1608_v60, 0.0  ;;  %vm99_vm5 = vcmp.gt.f32.partialorder %v1605_v55, 0.0  ;;  %vm102_vm11 = vcmp.gt.f32.partialorder %v1621_v5, 0.0 }
  0x23   :  { %153 = vmatpush.msra.mxu0 %v138_v14  ;;  %1110 = vmatpush.msra.mxu1 %v138_v14  ;;  %v1009_v63 = vadd.f32 %v1008_v61, %v1608_v60  ;;  %vm104_vm8 = vcmp.gt.f32.partialorder %v1630_v16, 0.0  ;;  %vm103_vm12 = vcmp.gt.f32.partialorder %v1626_v11, 0.0 }
  0x24   :  { %1118 = vmatpush.msra.mxu3 %v136_v19  ;;  %1111 = vmatpush.msra.mxu2 %v138_v14  ;;  %v64_v14 = vld [vmem:[#allocation7 + $0x10] sm:$0xff] }
  0x25   :  { %154 = vmatpush.msra.mxu0 %v137_v18  ;;  %1113 = vmatpush.msra.mxu1 %v137_v18  ;;  %v1010_v6 = vadd.f32 %v1009_v63, %v1614_v2 }
  0x26   :  { %1121 = vmatpush.msra.mxu3 %v135_v20  ;;  %1114 = vmatpush.msra.mxu2 %v137_v18 }
  0x27   :  { %155 = vmatpush.msra.mxu0 %v136_v19  ;;  %1116 = vmatpush.msra.mxu1 %v136_v19  ;;  %v1011_v10 = vadd.f32 %v1010_v6, %v1621_v5 }
  0x28   :  { %1124 = vmatpush.msra.mxu3 %v134_v21  ;;  %1117 = vmatpush.msra.mxu2 %v136_v19  ;;  %v74_v19 = vunpack.c.0.s8 %v64_v14 }
  0x29   :  { %156 = vmatpush.msra.mxu0 %v135_v20  ;;  %1119 = vmatpush.msra.mxu1 %v135_v20  ;;  %v1012_v13 = vadd.f32 %v1011_v10, %v1626_v11 }
  0x2a   :  { %472 = vperm.xlu1 %1147, %v413_v22   ;;  %492 = vperm.xlu0 %1146, %v417_v23  }
  0x2b   :  { %452 = vperm.xlu2 %1145, %v409_v24   ;;  %1127 = vmatpush.msra.mxu3 %v133_v25  ;;  %v75_v24 = vunpack.c.1.s8 %v64_v14 }
  0x2c   :  { %1120 = vmatpush.msra.mxu2 %v135_v20  ;;  %157 = vmatpush.msra.mxu0 %v134_v21  ;;  %v1637_v20 = vcvt.s32.f32 %v73_v17 }
  0x2d   :  { %1122 = vmatpush.msra.mxu1 %v134_v21  ;;  %1130 = vmatpush.msra.mxu3 %v132_v26 }
  0x2e   :  { %1123 = vmatpush.msra.mxu2 %v134_v21  ;;  %158 = vmatpush.msra.mxu0 %v133_v25  ;;  %v1013_v21 = vadd.f32 %v1012_v13, %v1630_v16  ;;  %v1452_v13 = vmov 0.0  }
  0x2f   :  { %1125 = vmatpush.msra.mxu1 %v133_v25  ;;  %1133 = vmatpush.msra.mxu3 %v131_v27  ;;  %61 = vst [vmem:[#allocation3] sm:$0x1] %v1452_v13 }
  0x30   :  { %1126 = vmatpush.msra.mxu2 %v133_v25  ;;  %159 = vmatpush.msra.mxu0 %v132_v26  ;;  %v1014_v23 = vadd.f32 %v1013_v21, %v1637_v20  ;;  %v1641_v25 = vcvt.s32.f32 %v74_v19  ;;  %60 = vst [vmem:[#allocation2] sm:$0x1] %v1452_v13 }
  0x31   :  { %1128 = vmatpush.msra.mxu1 %v132_v26  ;;  %1136 = vmatpush.msra.mxu3 %v130_v28 }
  0x32   :  { %1129 = vmatpush.msra.mxu2 %v132_v26  ;;  %160 = vmatpush.msra.mxu0 %v131_v27  ;;  %v1015_v26 = vadd.f32 %v1014_v23, %v1641_v25 }
  0x33   :  { %1131 = vmatpush.msra.mxu1 %v131_v27  ;;  %198 = vmatmul.f32.vlgmr.msra.gmra.mxu3 %v126_v29 }
  0x34   :  { %487 = vperm.xlu1 %1147, %v416_v30   ;;  %467 = vperm.xlu2 %1145, %v412_v31  }
  0x35   :  { %1132 = vmatpush.msra.mxu2 %v131_v27  ;;  %161 = vmatpush.msra.mxu0 %v130_v28  ;;  %v76_v27 = vunpack.c.2.s8 %v64_v14 }
  0x36   :  { %1134 = vmatpush.msra.mxu1 %v130_v28  ;;  %162 = vmatmul.f32.vlgmr.msra.gmra.mxu0 %v114_v32 }
  0x37   :  { %174 = vmatmul.f32.vlgmr.msra.gmra.mxu1 %v118_v33  ;;  %1135 = vmatpush.msra.mxu2 %v130_v28  ;;  %v1644_v28 = vcvt.s32.f32 %v75_v24 }
  0x38   :  { %186 = vmatmul.f32.vlgmr.msra.gmra.mxu2 %v122_v34 }
  0x39   :  { %v1016_v34 = vadd.f32 %v1015_v26, %v1644_v28  ;;  %vm107_vm14 = vcmp.gt.f32.partialorder %v1644_v28, 0.0 }
  0x3b   :  { %201 = vmatmul.f32.gmra.mxu3 %v127_v35  ;;  %v65_v35 = vld [vmem:[#allocation7 + $0x18] sm:$0xff] }
  0x3c   :  { %482 = vperm.xlu2 %1145, %v415_v36   ;;  %v1652_v36 = vcvt.s32.f32 %v76_v27  ;;  %v80_v0 = vunpack.c.2.s8 %v65_v35  ;;  %v81_v6 = vunpack.c.3.s8 %v65_v35 }
  0x3e   :  { %165 = vmatmul.f32.gmra.mxu0 %v115_v37  ;;  %v77_v37 = vunpack.c.3.s8 %v64_v14  ;;  %v1694_v19 = vcvt.s32.f32 %v80_v0 }
  0x3f   :  { %177 = vmatmul.f32.gmra.mxu1 %v119_v38 }
  0x40   :  { %189 = vmatmul.f32.gmra.mxu2 %v123_v39  ;;  %v1665_v50 = vcvt.s32.f32 %v77_v37  ;;  %2324 = vst [vmem:[#allocation16_spill] sm:$0xff] %v1694_v19 }
  0x43   :  { %204 = vmatmul.f32.gmra.mxu3 %v128_v40 }
  0x44   :  { %497 = vperm.xlu2 %1145, %v418_v41  }
  0x46   :  { %168 = vmatmul.f32.gmra.mxu0 %v116_v42  ;;  %v1017_v42 = vadd.f32 %v1016_v34, %v1652_v36 }
  0x47   :  { %180 = vmatmul.f32.gmra.mxu1 %v120_v43 }
  0x48   :  { %192 = vmatmul.f32.gmra.mxu2 %v124_v44  ;;  %v1018_v57 = vadd.f32 %v1017_v42, %v1665_v50 }
  0x4b   :  { %207 = vmatmul.f32.gmra.mxu3 %v129_v45 }
  0x4e   :  { %171 = vmatmul.f32.gmra.mxu0 %v117_v46  ;;  %v78_v46 = vunpack.c.0.s8 %v65_v35 }
  0x4f   :  { %183 = vmatmul.f32.gmra.mxu1 %v121_v47 }
  0x50   :  { %195 = vmatmul.f32.gmra.mxu2 %v125_v48  ;;  %v1678_v63 = vcvt.s32.f32 %v78_v46 }
  0x6a   :  { %v423_v56 = vpop.permute.xlu2 %422 }
  0x6b   :  { %v503_v58 = vadd.f32 %v1601_v51, %v423_v56 }
  0x6d   :  { %v535_v62 = vmul.f32 0.01, %v503_v58  ;;  %vm519_vm1 = vcmp.ge.f32.partialorder %v503_v58, 0.0 }
  0x6f   :  { %v551_v1 = vsel %vm519_vm1, %v503_v58, %v535_v62  ;;  %v79_v58 = vunpack.c.1.s8 %v65_v35 }
  0x70   :  { %v1618_v4 = vsel %vm98_vm0, %v551_v1, -1e+30 }
  0x71   :  { %583 = vmax.xlane.f32.xlu1 %v1618_v4 }
  0x72   :  { %v438_v7 = vpop.permute.xlu2 %437 }
  0x73   :  { %v506_v8 = vadd.f32 %v1601_v51, %v438_v7  ;;  %v1681_v7 = vcvt.s32.f32 %v79_v58 }
  0x75   :  { %v538_v12 = vmul.f32 0.01, %v506_v8  ;;  %vm522_vm3 = vcmp.ge.f32.partialorder %v506_v8, 0.0 }
  0x77   :  { %v554_v15 = vsel %vm522_vm3, %v506_v8, %v538_v12  ;;  %v1019_v8 = vadd.f32 %v1018_v57, %v1678_v63  ;;  %vm106_vm3 = vcmp.gt.f32.partialorder %v1641_v25, 0.0 }
  0x78   :  { %v1634_v18 = vsel %vm2312_vm2, %v554_v15, -1e+30 }
  0x79   :  { %589 = vmax.xlane.f32.xlu1 %v1634_v18  ;;  %v1020_v17 = vadd.f32 %v1019_v8, %v1681_v7 }
  0x7b   :  { %v443_v22 = vpop.permute.xlu2 %442  ;;  %v1021_v24 = vadd.f32 %v1020_v17, %v1694_v19 }
  0x7c   :  { %v507_v31 = vadd.f32 %v1601_v51, %v443_v22  ;;  %v1699_v22 = vcvt.s32.f32 %v81_v6 }
  0x7e   :  { %v539_v43 = vmul.f32 0.01, %v507_v31  ;;  %vm523_vm10 = vcmp.ge.f32.partialorder %v507_v31, 0.0  ;;  %2325 = vst [vmem:[#allocation17_spill] sm:$0xff] %v1699_v22 }
  0x80   :  { %v555_v62 = vsel %vm523_vm10, %v507_v31, %v539_v43  ;;  %v1022_v31 = vadd.f32 %v1021_v24, %v1699_v22 }
  0x81   :  { %v433_v29 = vpop.permute.xlu1 %432  ;;  %v1686_v10 = vsel %vm102_vm11, %v555_v62, -1e+30 }
  0x82   :  { %v428_v30 = vpop.permute.xlu0 %427  ;;  %v505_v32 = vadd.f32 %v1601_v51, %v433_v29 }
  0x83   :  { %v504_v33 = vadd.f32 %v1601_v51, %v428_v30 }
  0x84   :  { %v537_v38 = vmul.f32 0.01, %v505_v32  ;;  %vm521_vm6 = vcmp.ge.f32.partialorder %v505_v32, 0.0 }
  0x85   :  { %v536_v39 = vmul.f32 0.01, %v504_v33  ;;  %v453_v40 = vpop.permute.xlu2 %452  ;;  %vm520_vm7 = vcmp.ge.f32.partialorder %v504_v33, 0.0 }
  0x86   :  { %v509_v41 = vadd.f32 %v1601_v51, %v453_v40  ;;  %v553_v44 = vsel %vm521_vm6, %v505_v32, %v537_v38  ;;  %vm2311_vm6 = vcmp.gt.f32.partialorder %v1637_v20, 0.0  ;;  %v1023_v38 = vrot.slane %v1022_v31, 4 }
  0x87   :  { %v552_v45 = vsel %vm520_vm7, %v504_v33, %v536_v39  ;;  %v1659_v48 = vsel %vm100_vm4, %v553_v44, -1e+30 }
  0x88   :  { %v541_v47 = vmul.f32 0.01, %v509_v41  ;;  %v1663_v49 = vsel %vm99_vm5, %v552_v45, -1e+30  ;;  %587 = vmax.xlane.f32.xlu2 %v1659_v48  ;;  %vm525_vm9 = vcmp.ge.f32.partialorder %v509_v41, 0.0  ;;  %v1024_v44 = vadd.f32 %v1023_v38, %v1022_v31 }
  0x89   :  { %585 = vmax.xlane.f32.xlu0 %v1663_v49  ;;  %v448_v53 = vpop.permute.xlu1 %447 }
  0x8a   :  { %v557_v52 = vsel %vm525_vm9, %v509_v41, %v541_v47  ;;  %v463_v56 = vpop.permute.xlu0 %462  ;;  %v508_v61 = vadd.f32 %v1601_v51, %v448_v53  ;;  %vm110_vm9 = vcmp.gt.f32.partialorder %v1678_v63, 0.0  ;;  %v1025_v46 = vrot.slane %v1024_v44, 2 }
  0x8b   :  { %v1672_v59 = vsel %vm104_vm8, %v557_v52, -1e+30  ;;  %v511_v3 = vadd.f32 %v1601_v51, %v463_v56 }
  0x8c   :  { %595 = vmax.xlane.f32.xlu1 %v1672_v59  ;;  %v540_v1 = vmul.f32 0.01, %v508_v61  ;;  %vm524_vm13 = vcmp.ge.f32.partialorder %v508_v61, 0.0 }
  0x8d   :  { %v543_v21 = vmul.f32 0.01, %v511_v3  ;;  %vm527_vm1 = vcmp.ge.f32.partialorder %v511_v3, 0.0 }
  0x8e   :  { %v468_v9 = vpop.permute.xlu2 %467  ;;  %v556_v12 = vsel %vm524_vm13, %v508_v61, %v540_v1  ;;  %v1026_v61 = vadd.f32 %v1025_v46, %v1024_v44 }
  0x8f   :  { %v512_v14 = vadd.f32 %v1601_v51, %v468_v9  ;;  %v1691_v15 = vsel %vm103_vm12, %v556_v12, -1e+30  ;;  %v559_v34 = vsel %vm527_vm1, %v511_v3, %v543_v21  ;;  %vm108_vm1 = vcmp.gt.f32.partialorder %v1652_v36, 0.0  ;;  %v1007_v9 = vld [vmem:[#allocation3] sm:$0x1] }
  0x90   :  { %591 = vmax.xlane.f32.xlu2 %v1686_v10  ;;  %v1715_v41 = vsel %vm106_vm3, %v559_v34, -1e+30  ;;  %v1027_v3 = vrot.slane %v1026_v61, 1 }
  0x91   :  { %593 = vmax.xlane.f32.xlu0 %v1691_v15  ;;  %v544_v23 = vmul.f32 0.01, %v512_v14  ;;  %vm528_vm15 = vcmp.ge.f32.partialorder %v512_v14, 0.0 }
  0x92   :  { %v458_v26 = vpop.permute.xlu1 %457 }
  0x93   :  { %v478_v27 = vpop.permute.xlu0 %477  ;;  %v560_v29 = vsel %vm528_vm15, %v512_v14, %v544_v23  ;;  %v510_v30 = vadd.f32 %v1601_v51, %v458_v26  ;;  %vm109_vm15 = vcmp.gt.f32.partialorder %v1665_v50, 0.0  ;;  %v1028_v14 = vadd.f32 %v1027_v3, %v1026_v61 }
  0x94   :  { %v1706_v32 = vsel %vm107_vm14, %v560_v29, -1e+30  ;;  %v514_v33 = vadd.f32 %v1601_v51, %v478_v27 }
  0x95   :  { %601 = vmax.xlane.f32.xlu1 %v1706_v32  ;;  %v542_v35 = vmul.f32 0.01, %v510_v30  ;;  %vm526_vm7 = vcmp.ge.f32.partialorder %v510_v30, 0.0  ;;  %v1029_v23 = vadd.f32 %v1028_v14, %v1007_v9 }
  0x96   :  { %v483_v37 = vpop.permute.xlu2 %482  ;;  %v546_v42 = vmul.f32 0.01, %v514_v33  ;;  %vm530_vm13 = vcmp.ge.f32.partialorder %v514_v33, 0.0 }
  0x97   :  { %v515_v39 = vadd.f32 %v1601_v51, %v483_v37  ;;  %v558_v40 = vsel %vm526_vm7, %v510_v30, %v542_v35  ;;  %1030 = vst [vmem:[#allocation3] sm:$0x1] %v1029_v23 }
  0x98   :  { %v1719_v43 = vsel %vm2311_vm6, %v558_v40, -1e+30  ;;  %v562_v58 = vsel %vm530_vm13, %v514_v33, %v546_v42 }
  0x99   :  { %599 = vmax.xlane.f32.xlu0 %v1715_v41  ;;  %v547_v45 = vmul.f32 0.01, %v515_v39  ;;  %597 = vmax.xlane.f32.xlu2 %v1719_v43  ;;  %vm531_vm10 = vcmp.ge.f32.partialorder %v515_v39, 0.0  ;;  %v1736_v8 = vsel %vm109_vm15, %v562_v58, -1e+30 }
  0x9b   :  { %v563_v47 = vsel %vm531_vm10, %v515_v39, %v547_v45  ;;  %vm113_vm10 = vcmp.gt.f32.partialorder %v1699_v22, 0.0 }
  0x9c   :  { %v473_v52 = vpop.permute.xlu1 %472  ;;  %v1727_v53 = vsel %vm110_vm9, %v563_v47, -1e+30  ;;  %v493_v57 = vpop.permute.xlu0 %492 }
  0x9d   :  { %v513_v56 = vadd.f32 %v1601_v51, %v473_v52  ;;  %607 = vmax.xlane.f32.xlu1 %v1727_v53  ;;  %v517_v62 = vadd.f32 %v1601_v51, %v493_v57 }
  0x9e   :  { %v498_v1 = vpop.permute.xlu2 %497 }
  0x9f   :  { %v545_v0 = vmul.f32 0.01, %v513_v56  ;;  %vm529_vm7 = vcmp.ge.f32.partialorder %v513_v56, 0.0  ;;  %v518_v6 = vadd.f32 %v1601_v51, %v498_v1  ;;  %v549_v12 = vmul.f32 0.01, %v517_v62 }
  0xa0   :  { %vm533_vm6 = vcmp.ge.f32.partialorder %v517_v62, 0.0 }
  0xa1   :  { %v561_v13 = vsel %vm529_vm7, %v513_v56, %v545_v0  ;;  %605 = vmax.xlane.f32.xlu0 %v1736_v8  ;;  %v550_v17 = vmul.f32 0.01, %v518_v6  ;;  %vm534_vm13 = vcmp.ge.f32.partialorder %v518_v6, 0.0  ;;  %vm112_vm7 = vcmp.gt.f32.partialorder %v1694_v19, 0.0 }
  0xa2   :  { %v1742_v21 = vsel %vm108_vm1, %v561_v13, -1e+30  ;;  %v565_v27 = vsel %vm533_vm6, %v517_v62, %v549_v12  ;;  %vm2327_vm6 = vcmp.gt.f32.partialorder %v1637_v20, 0.0 }
  0xa3   :  { %603 = vmax.xlane.f32.xlu2 %v1742_v21  ;;  %v566_v24 = vsel %vm534_vm13, %v518_v6, %v550_v17  ;;  %v1754_v31 = vsel %vm112_vm7, %v565_v27, -1e+30  ;;  %vm111_vm13 = vcmp.gt.f32.partialorder %v1681_v7, 0.0 }
  0xa4   :  { %v1747_v26 = vsel %vm113_vm10, %v566_v24, -1e+30 }
  0xa5   :  { %613 = vmax.xlane.f32.xlu1 %v1747_v26 }
  0xa6   :  { %v488_v29 = vpop.permute.xlu1 %487 }
  0xa7   :  { %v516_v30 = vadd.f32 %v1601_v51, %v488_v29 }
  0xa9   :  { %v548_v33 = vmul.f32 0.01, %v516_v30  ;;  %vm532_vm2 = vcmp.ge.f32.partialorder %v516_v30, 0.0  ;;  %611 = vmax.xlane.f32.xlu0 %v1754_v31 }
  0xab   :  { %v564_v34 = vsel %vm532_vm2, %v516_v30, %v548_v33  ;;  %vm2326_vm2 = vcmp.gt.f32.partialorder %v1614_v2, 0.0 }
  0xac   :  { %v1760_v35 = vsel %vm111_vm13, %v564_v34, -1e+30 }
  0xad   :  { %609 = vmax.xlane.f32.xlu2 %v1760_v35 }
  0xb3   :  { %v163_v37 = vpop.f32.mrf.mxu0 }
  0xb4   :  { %v175_v38 = vpop.f32.mrf.mxu1  ;;  %v1769_v39 = vsel %vm98_vm0, %v163_v37, -1e+30 }
  0xb5   :  { %v1765_v51 = vsel %vm102_vm11, %v175_v38, -1e+30  ;;  %227 = vmax.xlane.f32.xlu0 %v1769_v39 }
  0xb6   :  { %235 = vmax.xlane.f32.xlu2 %v1765_v51  ;;  %v199_v40 = vpop.f32.mrf.mxu3 }
  0xb7   :  { %v1779_v46 = vsel %vm110_vm9, %v199_v40, -1e+30 }
  0xbb   :  { %v187_v42 = vpop.f32.mrf.mxu2  ;;  %v166_v44 = vpop.f32.mrf.mxu0 }
  0xbc   :  { %v1775_v45 = vsel %vm106_vm3, %v187_v42, -1e+30  ;;  %v178_v56 = vpop.f32.mrf.mxu1  ;;  %v1794_v62 = vsel %vm99_vm5, %v166_v44, -1e+30 }
  0xbd   :  { %251 = vmax.xlane.f32.xlu0 %v1779_v46  ;;  %v1790_v57 = vsel %vm103_vm12, %v178_v56, -1e+30 }
  0xbe   :  { %243 = vmax.xlane.f32.xlu2 %v1775_v45  ;;  %v202_v47 = vpop.f32.mrf.mxu3 }
  0xbf   :  { %v1785_v52 = vsel %vm111_vm13, %v202_v47, -1e+30 }
  0xc0   :  { %253 = vmax.xlane.f32.xlu1 %v1785_v52 }
  0xc3   :  { %v190_v58 = vpop.f32.mrf.mxu2  ;;  %v169_v61 = vpop.f32.mrf.mxu0 }
  0xc4   :  { %v1800_v0 = vsel %vm100_vm4, %v169_v61, -1e+30  ;;  %v1809_v9 = vsel %vm107_vm14, %v190_v58, -1e+30  ;;  %v181_v13 = vpop.f32.mrf.mxu1 }
  0xc5   :  { %229 = vmax.xlane.f32.xlu0 %v1794_v62  ;;  %v1820_v14 = vsel %vm104_vm8, %v181_v13, -1e+30 }
  0xc6   :  { %237 = vmax.xlane.f32.xlu2 %v1790_v57  ;;  %v205_v1 = vpop.f32.mrf.mxu3 }
  0xc7   :  { %v1805_v3 = vsel %vm112_vm7, %v205_v1, -1e+30 }
  0xc8   :  { %231 = vmax.xlane.f32.xlu1 %v1800_v0 }
  0xcb   :  { %v193_v6 = vpop.f32.mrf.mxu2  ;;  %v172_v17 = vpop.f32.mrf.mxu0 }
  0xcc   :  { %v1815_v12 = vsel %vm108_vm1, %v193_v6, -1e+30  ;;  %v1830_v27 = vsel %vm2326_vm2, %v172_v17, -1e+30  ;;  %v184_v33 = vpop.f32.mrf.mxu1 }
  0xcd   :  { %245 = vmax.xlane.f32.xlu0 %v1809_v9  ;;  %v1840_v34 = vsel %vm2327_vm6, %v184_v33, -1e+30 }
  0xce   :  { %255 = vmax.xlane.f32.xlu2 %v1805_v3  ;;  %v208_v29 = vpop.f32.mrf.mxu3 }
  0xcf   :  { %v1835_v30 = vsel %vm113_vm10, %v208_v29, -1e+30 }
  0xd0   :  { %247 = vmax.xlane.f32.xlu1 %v1815_v12 }
  0xd3   :  { %v196_v23 = vpop.f32.mrf.mxu2 }
  0xd4   :  { %v1824_v24 = vsel %vm109_vm15, %v196_v23, -1e+30 }
  0xd5   :  { %239 = vmax.xlane.f32.xlu0 %v1820_v14 }
  0xd6   :  { %249 = vmax.xlane.f32.xlu2 %v1824_v24 }
  0xd8   :  { %233 = vmax.xlane.f32.xlu1 %v1830_v27 }
  0xdd   :  { %257 = vmax.xlane.f32.xlu0 %v1835_v30 }
  0xe0   :  { %241 = vmax.xlane.f32.xlu1 %v1840_v34 }
  0xe4   :  { %v584_v37 = vpop.xlane.xlu1 %583 }
  0xe5   :  { %v615_v38 = vsub.f32 %v1618_v4, %v584_v37 }
  0xe7   :  { %v631_v40 = vmul.f32 1.442695, %v615_v38 }
  0xe9   :  { %1149 = vpow2.f32 %v631_v40 }
  0xec   :  { %v590_v42 = vpop.xlane.xlu1 %589 }
  0xed   :  { %v618_v44 = vsub.f32 %v1634_v18, %v590_v42 }
  0xef   :  { %v1150_v47 = vpop.eup %1149  ;;  %v637_v56 = vmul.f32 1.442695, %v618_v44 }
  0xf0   :  { %v1847_v58 = vsel %vm98_vm0, %v1150_v47, 0.0 }
  0xf1   :  { %1151 = vpow2.f32 %v637_v56  ;;  %679 = vadd.xlane.f32.xlu2 %v1847_v58 }
  0xf7   :  { %v1152_v61 = vpop.eup %1151 }
  0xf8   :  { %v1852_v1 = vsel %vm2326_vm2, %v1152_v61, 0.0 }
  0xf9   :  { %2328 = vst [vmem:[#allocation18_spill] sm:$0xff] %v1852_v1  ;;  %685 = vadd.xlane.f32.xlu2 %v1852_v1 }
  0xfb   :  { %v588_v4 = vpop.xlane.xlu2 %587 }
  0xfc   :  { %v586_v6 = vpop.xlane.xlu0 %585  ;;  %v617_v18 = vsub.f32 %v1659_v48, %v588_v4 }
  0xfd   :  { %v616_v13 = vsub.f32 %v1663_v49, %v586_v6 }
  0xfe   :  { %v635_v17 = vmul.f32 1.442695, %v617_v18 }
  0xff   :  { %v633_v23 = vmul.f32 1.442695, %v616_v13  ;;  %v596_v29 = vpop.xlane.xlu1 %595 }
 0x100   :  { %v621_v33 = vsub.f32 %v1672_v59, %v596_v29  ;;  %1153 = vpow2.f32 %v635_v17 }
 0x101   :  { %1155 = vpow2.f32 %v633_v23 }
 0x102   :  { %v643_v37 = vmul.f32 1.442695, %v621_v33 }
 0x103   :  { %v592_v38 = vpop.xlane.xlu2 %591 }
 0x104   :  { %1157 = vpow2.f32 %v643_v37  ;;  %v594_v40 = vpop.xlane.xlu0 %593  ;;  %v619_v42 = vsub.f32 %v1686_v10, %v592_v38 }
 0x105   :  { %v620_v44 = vsub.f32 %v1691_v15, %v594_v40 }
 0x106   :  { %v1154_v47 = vpop.eup %1153  ;;  %v639_v56 = vmul.f32 1.442695, %v619_v42 }
 0x107   :  { %v641_v48 = vmul.f32 1.442695, %v620_v44  ;;  %v1156_v61 = vpop.eup %1155  ;;  %v1862_v49 = vsel %vm100_vm4, %v1154_v47, 0.0 }
 0x108   :  { %1159 = vpow2.f32 %v639_v56  ;;  %v602_v59 = vpop.xlane.xlu1 %601  ;;  %683 = vadd.xlane.f32.xlu1 %v1862_v49  ;;  %v1867_v4 = vsel %vm99_vm5, %v1156_v61, 0.0 }
 0x109   :  { %1161 = vpow2.f32 %v641_v48  ;;  %v624_v10 = vsub.f32 %v1706_v32, %v602_v59  ;;  %681 = vadd.xlane.f32.xlu0 %v1867_v4 }
 0x10a   :  { %v1158_v6 = vpop.eup %1157 }
 0x10b   :  { %v1873_v15 = vsel %vm104_vm8, %v1158_v6, 0.0  ;;  %v649_v18 = vmul.f32 1.442695, %v624_v10 }
 0x10c   :  { %691 = vadd.xlane.f32.xlu2 %v1873_v15  ;;  %v600_v13 = vpop.xlane.xlu0 %599  ;;  %v598_v17 = vpop.xlane.xlu2 %597 }
 0x10d   :  { %v623_v23 = vsub.f32 %v1715_v41, %v600_v13  ;;  %1163 = vpow2.f32 %v649_v18  ;;  %v622_v29 = vsub.f32 %v1719_v43, %v598_v17 }
 0x10e   :  { %v1160_v33 = vpop.eup %1159 }
 0x10f   :  { %v647_v37 = vmul.f32 1.442695, %v623_v23  ;;  %v1162_v38 = vpop.eup %1161  ;;  %v645_v32 = vmul.f32 1.442695, %v622_v29  ;;  %v1880_v40 = vsel %vm102_vm11, %v1160_v33, 0.0 }
 0x110   :  { %v1884_v42 = vsel %vm103_vm12, %v1162_v38, 0.0  ;;  %v1910_v17 = vpop.xlane.xlu1 %607 }
 0x111   :  { %1165 = vpow2.f32 %v647_v37  ;;  %689 = vadd.xlane.f32.xlu1 %v1884_v42  ;;  %687 = vadd.xlane.f32.xlu0 %v1880_v40 }
 0x112   :  { %1167 = vpow2.f32 %v645_v32 }
 0x113   :  { %v1164_v41 = vpop.eup %1163 }
 0x114   :  { %v1890_v43 = vsel %vm107_vm14, %v1164_v41, 0.0  ;;  %v1892_v44 = vpop.xlane.xlu0 %605 }
 0x115   :  { %2329 = vst [vmem:[#allocation19_spill] sm:$0xff] %v1890_v43  ;;  %697 = vadd.xlane.f32.xlu2 %v1890_v43 }
 0x116   :  { %v604_v47 = vpop.xlane.xlu2 %603 }
 0x117   :  { %v1166_v56 = vpop.eup %1165  ;;  %v625_v48 = vsub.f32 %v1742_v21, %v604_v47 }
 0x118   :  { %v1168_v61 = vpop.eup %1167  ;;  %v1898_v59 = vsel %vm106_vm3, %v1166_v56, 0.0  ;;  %v1919_v32 = vpop.xlane.xlu1 %613 }
 0x119   :  { %v651_v6 = vmul.f32 1.442695, %v625_v48  ;;  %v1902_v10 = vsel %vm2327_vm6, %v1168_v61, 0.0  ;;  %695 = vadd.xlane.f32.xlu1 %v1898_v59 }
 0x11a   :  { %2330 = vst [vmem:[#allocation20_spill] sm:$0xff] %v1902_v10  ;;  %693 = vadd.xlane.f32.xlu0 %v1902_v10 }
 0x11b   :  { %1169 = vpow2.f32 %v651_v6 }
 0x11c   :  { %v1906_v18 = vpop.xlane.xlu0 %611 }
 0x120   :  { %v1908_v13 = vpop.xlane.xlu2 %609 }
 0x121   :  { %v1170_v21 = vpop.eup %1169 }
 0x122   :  { %v1914_v23 = vsel %vm108_vm1, %v1170_v21, 0.0 }
 0x123   :  { %2331 = vst [vmem:[#allocation21_spill] sm:$0xff] %v1914_v23  ;;  %699 = vadd.xlane.f32.xlu0 %v1914_v23 }
 0x128   :  { %v228_v33 = vpop.xlane.xlu0 %227 }
 0x129   :  { %v236_v29 = vpop.xlane.xlu2 %235  ;;  %v259_v38 = vsub.f32 %v1769_v39, %v228_v33 }
 0x12a   :  { %v263_v37 = vsub.f32 %v1765_v51, %v236_v29 }
 0x12b   :  { %v275_v47 = vmul.f32 1.442695, %v259_v38 }
 0x12c   :  { %v283_v41 = vmul.f32 1.442695, %v263_v37 }
 0x12e   :  { %1171 = vpow2.f32 %v283_v41 }
 0x12f   :  { %1173 = vpow2.f32 %v275_v47 }
 0x130   :  { %v252_v48 = vpop.xlane.xlu0 %251 }
 0x131   :  { %v244_v56 = vpop.xlane.xlu2 %243  ;;  %v271_v6 = vsub.f32 %v1779_v46, %v252_v48 }
 0x132   :  { %v267_v61 = vsub.f32 %v1775_v45, %v244_v56 }
 0x133   :  { %v299_v43 = vmul.f32 1.442695, %v271_v6  ;;  %v254_v10 = vpop.xlane.xlu1 %253 }
 0x134   :  { %v1172_v21 = vpop.eup %1171  ;;  %v291_v23 = vmul.f32 1.442695, %v267_v61  ;;  %v272_v56 = vsub.f32 %v1785_v52, %v254_v10 }
 0x135   :  { %v1174_v1 = vpop.eup %1173  ;;  %v1925_v51 = vsel %vm102_vm11, %v1172_v21, 0.0 }
 0x136   :  { %1175 = vpow2.f32 %v291_v23  ;;  %331 = vadd.xlane.f32.xlu2 %v1925_v51  ;;  %v1930_v39 = vsel %vm98_vm0, %v1174_v1, 0.0 }
 0x137   :  { %1177 = vpow2.f32 %v299_v43  ;;  %323 = vadd.xlane.f32.xlu1 %v1930_v39  ;;  %v301_v43 = vmul.f32 1.442695, %v272_v56 }
 0x138   :  { %v230_v46 = vpop.xlane.xlu0 %229 }
 0x139   :  { %v238_v45 = vpop.xlane.xlu2 %237  ;;  %v260_v33 = vsub.f32 %v1794_v62, %v230_v46 }
 0x13a   :  { %v264_v29 = vsub.f32 %v1790_v57, %v238_v45 }
 0x13b   :  { %v277_v41 = vmul.f32 1.442695, %v260_v33  ;;  %v232_v47 = vpop.xlane.xlu1 %231 }
 0x13c   :  { %v1176_v37 = vpop.eup %1175  ;;  %v285_v38 = vmul.f32 1.442695, %v264_v29  ;;  %v261_v48 = vsub.f32 %v1800_v0, %v232_v47 }
 0x13d   :  { %v1178_v23 = vpop.eup %1177  ;;  %v1939_v1 = vsel %vm106_vm3, %v1176_v37, 0.0 }
 0x13e   :  { %1179 = vpow2.f32 %v285_v38  ;;  %339 = vadd.xlane.f32.xlu0 %v1939_v1  ;;  %v1944_v57 = vsel %vm110_vm9, %v1178_v23, 0.0  ;;  %v279_v62 = vmul.f32 1.442695, %v261_v48 }
 0x13f   :  { %1181 = vpow2.f32 %v277_v41  ;;  %347 = vadd.xlane.f32.xlu1 %v1944_v57 }
 0x140   :  { %v246_v52 = vpop.xlane.xlu0 %245  ;;  %1183 = vpow2.f32 %v279_v62 }
 0x141   :  { %v256_v61 = vpop.xlane.xlu2 %255  ;;  %v268_v0 = vsub.f32 %v1809_v9, %v246_v52  ;;  %1185 = vpow2.f32 %v301_v43 }
 0x142   :  { %v273_v6 = vsub.f32 %v1805_v3, %v256_v61 }
 0x143   :  { %v293_v21 = vmul.f32 1.442695, %v268_v0  ;;  %v248_v45 = vpop.xlane.xlu1 %247 }
 0x144   :  { %v1180_v10 = vpop.eup %1179  ;;  %v269_v29 = vsub.f32 %v1815_v12, %v248_v45  ;;  %v303_v3 = vmul.f32 1.442695, %v273_v6 }
 0x145   :  { %v1182_v46 = vpop.eup %1181  ;;  %v1952_v33 = vsel %vm103_vm12, %v1180_v10, 0.0  ;;  %1187 = vpow2.f32 %v293_v21  ;;  %v628_v21 = vsub.f32 %v1760_v35, %v1908_v13 }
 0x146   :  { %333 = vadd.xlane.f32.xlu0 %v1952_v33  ;;  %v1957_v37 = vsel %vm99_vm5, %v1182_v46, 0.0  ;;  %v295_v9 = vmul.f32 1.442695, %v269_v29  ;;  %v1184_v47 = vpop.eup %1183  ;;  %1189 = vpow2.f32 %v303_v3  ;;  %v626_v29 = vsub.f32 %v1736_v8, %v1892_v44 }
 0x147   :  { %325 = vadd.xlane.f32.xlu2 %v1957_v37  ;;  %v1186_v23 = vpop.eup %1185  ;;  %v1965_v52 = vsel %vm100_vm4, %v1184_v47, 0.0  ;;  %v627_v8 = vsub.f32 %v1727_v53, %v1910_v17 }
 0x148   :  { %v240_v41 = vpop.xlane.xlu0 %239  ;;  %1191 = vpow2.f32 %v295_v9  ;;  %v1970_v0 = vsel %vm111_vm13, %v1186_v23, 0.0  ;;  %v653_v13 = vmul.f32 1.442695, %v626_v29 }
 0x149   :  { %v250_v38 = vpop.xlane.xlu2 %249  ;;  %v265_v12 = vsub.f32 %v1820_v14, %v240_v41  ;;  %v655_v23 = vmul.f32 1.442695, %v627_v8 }
 0x14a   :  { %v270_v56 = vsub.f32 %v1824_v24, %v250_v38 }
 0x14b   :  { %v287_v48 = vmul.f32 1.442695, %v265_v12  ;;  %v234_v62 = vpop.xlane.xlu1 %233  ;;  %v1188_v43 = vpop.eup %1187 }
 0x14c   :  { %v262_v61 = vsub.f32 %v1830_v27, %v234_v62  ;;  %v1974_v14 = vsel %vm107_vm14, %v1188_v43, 0.0  ;;  %v297_v24 = vmul.f32 1.442695, %v270_v56  ;;  %v1190_v10 = vpop.eup %1189  ;;  %v630_v62 = vsub.f32 %v1747_v26, %v1919_v32 }
 0x14d   :  { %1193 = vpow2.f32 %v287_v48  ;;  %341 = vadd.xlane.f32.xlu1 %v1974_v14  ;;  %v1985_v9 = vsel %vm112_vm7, %v1190_v10, 0.0 }
 0x14e   :  { %327 = vadd.xlane.f32.xlu0 %v1965_v52  ;;  %v281_v27 = vmul.f32 1.442695, %v262_v61  ;;  %v1192_v6 = vpop.eup %1191  ;;  %1195 = vpow2.f32 %v297_v24  ;;  %2332 = vst [vmem:[#allocation22_spill] sm:$0xff] %v1985_v9 }
 0x14f   :  { %349 = vadd.xlane.f32.xlu2 %v1970_v0  ;;  %v1990_v38 = vsel %vm108_vm1, %v1192_v6, 0.0  ;;  %v629_v6 = vsub.f32 %v1754_v31, %v1906_v18 }
 0x150   :  { %1197 = vpow2.f32 %v281_v27  ;;  %v258_v47 = vpop.xlane.xlu0 %257  ;;  %v661_v27 = vmul.f32 1.442695, %v630_v62 }
 0x151   :  { %v274_v56 = vsub.f32 %v1835_v30, %v258_v47 }
 0x153   :  { %v242_v45 = vpop.xlane.xlu1 %241  ;;  %v1194_v46 = vpop.eup %1193  ;;  %v305_v43 = vmul.f32 1.442695, %v274_v56 }
 0x154   :  { %v266_v3 = vsub.f32 %v1840_v34, %v242_v45  ;;  %v1994_v35 = vsel %vm104_vm8, %v1194_v46, 0.0  ;;  %v657_v34 = vmul.f32 1.442695, %v628_v21  ;;  %v1196_v41 = vpop.eup %1195  ;;  %v659_v45 = vmul.f32 1.442695, %v629_v6 }
 0x155   :  { %335 = vadd.xlane.f32.xlu1 %v1994_v35  ;;  %v2003_v48 = vsel %vm109_vm15, %v1196_v41, 0.0 }
 0x156   :  { %351 = vadd.xlane.f32.xlu0 %v1985_v9  ;;  %v289_v44 = vmul.f32 1.442695, %v266_v3  ;;  %v1198_v12 = vpop.eup %1197 }
 0x157   :  { %343 = vadd.xlane.f32.xlu2 %v1990_v38  ;;  %v2008_v53 = vsel %vm2326_vm2, %v1198_v12, 0.0 }
 0x158   :  { %1199 = vpow2.f32 %v289_v44 }
 0x159   :  { %1201 = vpow2.f32 %v657_v34 }
 0x15a   :  { %1203 = vpow2.f32 %v653_v13 }
 0x15b   :  { %1205 = vpow2.f32 %v655_v23 }
 0x15c   :  { %1207 = vpow2.f32 %v305_v43 }
 0x15d   :  { %329 = vadd.xlane.f32.xlu1 %v2008_v53  ;;  %1209 = vpow2.f32 %v661_v27 }
 0x15e   :  { %345 = vadd.xlane.f32.xlu0 %v2003_v48  ;;  %v1200_v17 = vpop.eup %1199  ;;  %1211 = vpow2.f32 %v659_v45 }
 0x15f   :  { %v2015_v30 = vsel %vm2327_vm6, %v1200_v17, 0.0  ;;  %v1202_v61 = vpop.eup %1201 }
 0x160   :  { %337 = vadd.xlane.f32.xlu2 %v2015_v30  ;;  %v1204_v24 = vpop.eup %1203  ;;  %v2022_v26 = vsel %vm111_vm13, %v1202_v61, 0.0 }
 0x161   :  { %v1206_v10 = vpop.eup %1205  ;;  %v2027_v32 = vsel %vm109_vm15, %v1204_v24, 0.0 }
 0x162   :  { %v2032_v21 = vsel %vm110_vm9, %v1206_v10, 0.0  ;;  %v1208_v31 = vpop.eup %1207 }
 0x163   :  { %v1210_v18 = vpop.eup %1209  ;;  %v2037_v46 = vsel %vm113_vm10, %v1208_v31, 0.0 }
 0x164   :  { %2333 = vst [vmem:[#allocation23_spill] sm:$0xff] %v2037_v46  ;;  %v2042_v29 = vsel %vm113_vm10, %v1210_v18, 0.0  ;;  %v1212_v3 = vpop.eup %1211  ;;  %v680_v44 = vpop.xlane.xlu2 %679 }
 0x165   :  { %701 = vadd.xlane.f32.xlu1 %v2027_v32  ;;  %v2047_v8 = vsel %vm112_vm7, %v1212_v3, 0.0  ;;  %v711_v61 = vadd.f32 1e-16, %v680_v44 }
 0x166   :  { %705 = vadd.xlane.f32.xlu0 %v2022_v26  ;;  %2334 = vst [vmem:[#allocation24_spill] sm:$0xff] %v2047_v8 }
 0x168   :  { %703 = vadd.xlane.f32.xlu2 %v2032_v21 }
 0x16c   :  { %v2050_v41 = vpop.xlane.xlu2 %685 }
 0x16d   :  { %353 = vadd.xlane.f32.xlu1 %v2037_v46 }
 0x170   :  { %709 = vadd.xlane.f32.xlu2 %v2042_v29 }
 0x175   :  { %707 = vadd.xlane.f32.xlu1 %v2047_v8 }
 0x17b   :  { %v684_v13 = vpop.xlane.xlu1 %683 }
 0x17c   :  { %v682_v34 = vpop.xlane.xlu0 %681 }
 0x17f   :  { %v692_v12 = vpop.xlane.xlu2 %691 }
 0x184   :  { %v688_v47 = vpop.xlane.xlu0 %687  ;;  %v690_v23 = vpop.xlane.xlu1 %689 }
 0x185   :  { %v715_v43 = vadd.f32 1e-16, %v688_v47 }
 0x187   :  { %1213 = vrcp.f32 %v715_v43 }
 0x188   :  { %v2054_v17 = vpop.xlane.xlu2 %697  ;;  %1215 = vrcp.f32 %v711_v61  ;;  %v712_v61 = vadd.f32 1e-16, %v682_v34 }
 0x18c   :  { %v696_v62 = vpop.xlane.xlu1 %695 }
 0x18d   :  { %v2052_v56 = vpop.xlane.xlu0 %693  ;;  %v1214_v31 = vpop.eup %1213 }
 0x18e   :  { %v1216_v18 = vpop.eup %1215  ;;  %v747_v47 = vmul.f32 %v1214_v31, %v1880_v40 }
 0x18f   :  { %v743_v9 = vmul.f32 %v1216_v18, %v1847_v58 }
 0x196   :  { %v2056_v24 = vpop.xlane.xlu0 %699 }
 0x1a9   :  { %v332_v27 = vpop.xlane.xlu2 %331 }
 0x1aa   :  { %v359_v10 = vadd.f32 1e-16, %v332_v27  ;;  %v324_v6 = vpop.xlane.xlu1 %323  ;;  %v716_v27 = vadd.f32 1e-16, %v690_v23 }
 0x1ab   :  { %v355_v45 = vadd.f32 1e-16, %v324_v6 }
 0x1ac   :  { %1217 = vrcp.f32 %v359_v10 }
 0x1ad   :  { %1219 = vrcp.f32 %v355_v45 }
 0x1ae   :  { %1221 = vrcp.f32 %v716_v27  ;;  %v719_v27 = vadd.f32 1e-16, %v696_v62 }
 0x1af   :  { %1223 = vrcp.f32 %v712_v61 }
 0x1b1   :  { %v340_v3 = vpop.xlane.xlu0 %339 }
 0x1b2   :  { %v1218_v22 = vpop.eup %1217  ;;  %v363_v23 = vadd.f32 1e-16, %v340_v3 }
 0x1b3   :  { %v1220_v19 = vpop.eup %1219  ;;  %v391_v8 = vmul.f32 %v1218_v22, %v1925_v51 }
 0x1b4   :  { %v387_v44 = vmul.f32 %v1220_v19, %v1930_v39  ;;  %v2072_v19 = vpop.xlane.xlu1 %347  ;;  %v713_v39 = vadd.f32 1e-16, %v684_v13 }
 0x1b5   :  { %v763_v43 = vmul.f32 %v747_v47, %v391_v8 }
 0x1b6   :  { %v759_v46 = vmul.f32 %v743_v9, %v387_v44  ;;  %v1222_v9 = vpop.eup %1221 }
 0x1b7   :  { %v2064_v10 = vsel %vm102_vm11, %v763_v43, -1e+30  ;;  %v1224_v8 = vpop.eup %1223  ;;  %v748_v43 = vmul.f32 %v1222_v9, %v1884_v42 }
 0x1b8   :  { %v2068_v6 = vsel %vm98_vm0, %v759_v46, -1e+30  ;;  %799 = vmax.xlane.f32.xlu1 %v2064_v10  ;;  %v744_v13 = vmul.f32 %v1224_v8, %v1867_v4 }
 0x1b9   :  { %791 = vmax.xlane.f32.xlu0 %v2068_v6  ;;  %v334_v22 = vpop.xlane.xlu0 %333 }
 0x1ba   :  { %v326_v58 = vpop.xlane.xlu2 %325  ;;  %v360_v40 = vadd.f32 1e-16, %v334_v22 }
 0x1bb   :  { %v356_v51 = vadd.f32 1e-16, %v326_v58 }
 0x1bc   :  { %1225 = vrcp.f32 %v360_v40  ;;  %v717_v40 = vadd.f32 1e-16, %v692_v12 }
 0x1bd   :  { %1227 = vrcp.f32 %v356_v51 }
 0x1be   :  { %1229 = vrcp.f32 %v713_v39 }
 0x1c0   :  { %v342_v31 = vpop.xlane.xlu1 %341 }
 0x1c1   :  { %v328_v34 = vpop.xlane.xlu0 %327 }
 0x1c2   :  { %v1226_v46 = vpop.eup %1225  ;;  %v2074_v45 = vpop.xlane.xlu2 %349  ;;  %v357_v18 = vadd.f32 1e-16, %v328_v34 }
 0x1c3   :  { %v1228_v47 = vpop.eup %1227  ;;  %v392_v44 = vmul.f32 %v1226_v46, %v1952_v33 }
 0x1c4   :  { %1231 = vrcp.f32 %v357_v18  ;;  %v388_v61 = vmul.f32 %v1228_v47, %v1957_v37  ;;  %v1230_v51 = vpop.eup %1229 }
 0x1c5   :  { %v764_v22 = vmul.f32 %v748_v43, %v392_v44  ;;  %1233 = vrcp.f32 %v363_v23  ;;  %v745_v39 = vmul.f32 %v1230_v51, %v1862_v49  ;;  %v714_v23 = vadd.f32 1e-16, %v2050_v41 }
 0x1c6   :  { %v760_v58 = vmul.f32 %v744_v13, %v388_v61  ;;  %1235 = vrcp.f32 %v719_v27  ;;  %v718_v44 = vadd.f32 1e-16, %v2052_v56  ;;  %v720_v27 = vadd.f32 1e-16, %v2054_v17 }
 0x1c7   :  { %v2082_v3 = vsel %vm103_vm12, %v764_v22, -1e+30  ;;  %1237 = vrcp.f32 %v717_v40 }
 0x1c8   :  { %v2086_v33 = vsel %vm99_vm5, %v760_v58, -1e+30  ;;  %801 = vmax.xlane.f32.xlu2 %v2082_v3  ;;  %v336_v37 = vpop.xlane.xlu1 %335  ;;  %v364_v58 = vadd.f32 1e-16, %v342_v31 }
 0x1c9   :  { %793 = vmax.xlane.f32.xlu1 %v2086_v33  ;;  %v2090_v42 = vpop.xlane.xlu0 %351  ;;  %v361_v12 = vadd.f32 1e-16, %v336_v37 }
 0x1ca   :  { %v1232_v4 = vpop.eup %1231  ;;  %v344_v8 = vpop.xlane.xlu2 %343 }
 0x1cb   :  { %v389_v62 = vmul.f32 %v1232_v4, %v1965_v52  ;;  %v1234_v9 = vpop.eup %1233  ;;  %1239 = vrcp.f32 %v361_v12  ;;  %v365_v51 = vadd.f32 1e-16, %v344_v8 }
 0x1cc   :  { %v1236_v46 = vpop.eup %1235  ;;  %v395_v47 = vmul.f32 %v1234_v9, %v1939_v1  ;;  %1241 = vrcp.f32 %v714_v23  ;;  %v2335_v23 = vld [vmem:[#allocation18_spill] sm:$0xff] }
 0x1cd   :  { %v761_v34 = vmul.f32 %v745_v39, %v389_v62  ;;  %v1238_v52 = vpop.eup %1237  ;;  %v751_v49 = vmul.f32 %v1236_v46, %v1898_v59  ;;  %1243 = vrcp.f32 %v718_v44  ;;  %v721_v59 = vadd.f32 1e-16, %v2056_v24 }
 0x1ce   :  { %v749_v1 = vmul.f32 %v1238_v52, %v1873_v15 }
 0x1cf   :  { %v2097_v18 = vsel %vm100_vm4, %v761_v34, -1e+30  ;;  %v767_v41 = vmul.f32 %v751_v49, %v395_v47 }
 0x1d0   :  { %795 = vmax.xlane.f32.xlu2 %v2097_v18  ;;  %v330_v61 = vpop.xlane.xlu1 %329 }
 0x1d1   :  { %v346_v43 = vpop.xlane.xlu0 %345  ;;  %v358_v13 = vadd.f32 1e-16, %v330_v61  ;;  %v1240_v22 = vpop.eup %1239  ;;  %v2109_v12 = vsel %vm106_vm3, %v767_v41, -1e+30  ;;  %v2336_v41 = vld [vmem:[#allocation20_spill] sm:$0xff] }
 0x1d2   :  { %v393_v4 = vmul.f32 %v1240_v22, %v1994_v35  ;;  %v366_v37 = vadd.f32 1e-16, %v346_v43  ;;  %v1242_v31 = vpop.eup %1241 }
 0x1d3   :  { %v338_v40 = vpop.xlane.xlu2 %337  ;;  %1245 = vrcp.f32 %v358_v13  ;;  %v1244_v35 = vpop.eup %1243  ;;  %v746_v47 = vmul.f32 %v1242_v31, %v2335_v23 }
 0x1d4   :  { %v362_v56 = vadd.f32 1e-16, %v338_v40  ;;  %1247 = vrcp.f32 %v720_v27  ;;  %v765_v17 = vmul.f32 %v749_v1, %v393_v4  ;;  %v367_v27 = vadd.f32 1e-16, %v2072_v19 }
 0x1d5   :  { %v750_v22 = vmul.f32 %v1244_v35, %v2336_v41  ;;  %v368_v40 = vadd.f32 1e-16, %v2074_v45 }
 0x1d6   :  { %1249 = vrcp.f32 %v362_v56  ;;  %v2114_v15 = vsel %vm104_vm8, %v765_v17, -1e+30 }
 0x1d7   :  { %1251 = vrcp.f32 %v364_v58  ;;  %803 = vmax.xlane.f32.xlu0 %v2114_v15 }
 0x1d8   :  { %807 = vmax.xlane.f32.xlu2 %v2109_v12  ;;  %1253 = vrcp.f32 %v365_v51  ;;  %v702_v24 = vpop.xlane.xlu1 %701 }
 0x1d9   :  { %1255 = vrcp.f32 %v721_v59  ;;  %v706_v62 = vpop.xlane.xlu0 %705  ;;  %v1246_v39 = vpop.eup %1245  ;;  %v722_v9 = vadd.f32 1e-16, %v702_v24  ;;  %v2338_v24 = vld [vmem:[#allocation21_spill] sm:$0xff] }
 0x1da   :  { %1257 = vrcp.f32 %v366_v37  ;;  %v1248_v8 = vpop.eup %1247  ;;  %v390_v46 = vmul.f32 %v1246_v39, %v2008_v53  ;;  %v724_v52 = vadd.f32 1e-16, %v706_v62  ;;  %v2337_v37 = vld [vmem:[#allocation19_spill] sm:$0xff] }
 0x1db   :  { %v704_v34 = vpop.xlane.xlu2 %703  ;;  %1259 = vrcp.f32 %v722_v9  ;;  %v752_v17 = vmul.f32 %v1248_v8, %v2337_v37 }
 0x1dc   :  { %v1250_v44 = vpop.eup %1249  ;;  %v723_v43 = vadd.f32 1e-16, %v704_v34  ;;  %v762_v61 = vmul.f32 %v746_v47, %v390_v46 }
 0x1dd   :  { %v1252_v49 = vpop.eup %1251  ;;  %v394_v13 = vmul.f32 %v1250_v44, %v2015_v30  ;;  %v369_v44 = vadd.f32 1e-16, %v2090_v42 }
 0x1de   :  { %v1254_v58 = vpop.eup %1253  ;;  %1261 = vrcp.f32 %v723_v43  ;;  %v2125_v53 = vsel %vm2326_vm2, %v762_v61, -1e+30  ;;  %v396_v4 = vmul.f32 %v1252_v49, %v1974_v14 }
 0x1df   :  { %v1256_v1 = vpop.eup %1255  ;;  %v766_v51 = vmul.f32 %v750_v22, %v394_v13  ;;  %1263 = vrcp.f32 %v724_v52  ;;  %797 = vmax.xlane.f32.xlu0 %v2125_v53  ;;  %v397_v45 = vmul.f32 %v1254_v58, %v1990_v38 }
 0x1e0   :  { %v1258_v56 = vpop.eup %1257  ;;  %1265 = vrcp.f32 %v367_v27  ;;  %v354_v30 = vpop.xlane.xlu1 %353  ;;  %v753_v62 = vmul.f32 %v1256_v1, %v2338_v24  ;;  %v768_v9 = vmul.f32 %v752_v17, %v396_v4 }
 0x1e1   :  { %v2131_v19 = vsel %vm2327_vm6, %v766_v51, -1e+30  ;;  %v1260_v59 = vpop.eup %1259  ;;  %1267 = vrcp.f32 %v368_v40  ;;  %v398_v35 = vmul.f32 %v1258_v56, %v2003_v48  ;;  %v370_v46 = vadd.f32 1e-16, %v354_v30  ;;  %v2340_v30 = vld [vmem:[#allocation22_spill] sm:$0xff] }
 0x1e2   :  { %805 = vmax.xlane.f32.xlu1 %v2131_v19  ;;  %v754_v14 = vmul.f32 %v1260_v59, %v2027_v32  ;;  %v769_v47 = vmul.f32 %v753_v62, %v397_v45  ;;  %v2146_v32 = vsel %vm107_vm14, %v768_v9, -1e+30  ;;  %v2341_v59 = vld [vmem:[#allocation24_spill] sm:$0xff] }
 0x1e3   :  { %v710_v31 = vpop.xlane.xlu2 %709 }
 0x1e4   :  { %v726_v39 = vadd.f32 1e-16, %v710_v31  ;;  %v1262_v34 = vpop.eup %1261  ;;  %v770_v23 = vmul.f32 %v754_v14, %v398_v35  ;;  %v2153_v42 = vsel %vm108_vm1, %v769_v47, -1e+30 }
 0x1e5   :  { %v1264_v38 = vpop.eup %1263  ;;  %v755_v43 = vmul.f32 %v1262_v34, %v2032_v21 }
 0x1e6   :  { %v1266_v52 = vpop.eup %1265  ;;  %1269 = vrcp.f32 %v726_v39  ;;  %v2142_v8 = vsel %vm109_vm15, %v770_v23, -1e+30  ;;  %v756_v27 = vmul.f32 %v1264_v38, %v2022_v26 }
 0x1e7   :  { %v1268_v48 = vpop.eup %1267  ;;  %813 = vmax.xlane.f32.xlu2 %v2142_v8  ;;  %1271 = vrcp.f32 %v370_v46  ;;  %809 = vmax.xlane.f32.xlu0 %v2146_v32  ;;  %v399_v13 = vmul.f32 %v1266_v52, %v1944_v57 }
 0x1e8   :  { %v708_v49 = vpop.xlane.xlu1 %707  ;;  %1273 = vrcp.f32 %v369_v44  ;;  %v400_v41 = vmul.f32 %v1268_v48, %v1970_v0  ;;  %v2339_v0 = vld [vmem:[#allocation23_spill] sm:$0xff] }
 0x1e9   :  { %v725_v61 = vadd.f32 1e-16, %v708_v49  ;;  %v771_v21 = vmul.f32 %v755_v43, %v399_v13 }
 0x1ea   :  { %811 = vmax.xlane.f32.xlu1 %v2153_v42  ;;  %v772_v58 = vmul.f32 %v756_v27, %v400_v41 }
 0x1eb   :  { %1275 = vrcp.f32 %v725_v61  ;;  %v2161_v51 = vsel %vm110_vm9, %v771_v21, -1e+30 }
 0x1ec   :  { %v1270_v22 = vpop.eup %1269  ;;  %v2167_v56 = vsel %vm111_vm13, %v772_v58, -1e+30 }
 0x1ed   :  { %v1272_v40 = vpop.eup %1271  ;;  %v758_v26 = vmul.f32 %v1270_v22, %v2042_v29 }
 0x1ee   :  { %v1274_v1 = vpop.eup %1273  ;;  %v402_v4 = vmul.f32 %v1272_v40, %v2339_v0 }
 0x1ef   :  { %815 = vmax.xlane.f32.xlu0 %v2161_v51  ;;  %v401_v45 = vmul.f32 %v1274_v1, %v2340_v30 }
 0x1f0   :  { %v774_v17 = vmul.f32 %v758_v26, %v402_v4 }
 0x1f1   :  { %v1276_v57 = vpop.eup %1275 }
 0x1f2   :  { %817 = vmax.xlane.f32.xlu1 %v2167_v56  ;;  %v757_v37 = vmul.f32 %v1276_v57, %v2341_v59  ;;  %v2179_v24 = vsel %vm113_vm10, %v774_v17, -1e+30 }
 0x1f4   :  { %v773_v31 = vmul.f32 %v757_v37, %v401_v45 }
 0x1f6   :  { %v2175_v29 = vsel %vm112_vm7, %v773_v31, -1e+30 }
 0x1f7   :  { %819 = vmax.xlane.f32.xlu2 %v2175_v29  ;;  %821 = vmax.xlane.f32.xlu0 %v2179_v24 }
 0x22b   :  { %v800_v62 = vpop.xlane.xlu1 %799 }
 0x22c   :  { %v827_v39 = vsub.f32 %v2064_v10, %v800_v62  ;;  %v792_v9 = vpop.xlane.xlu0 %791 }
 0x22d   :  { %v823_v34 = vsub.f32 %v2068_v6, %v792_v9 }
 0x22e   :  { %v847_v46 = vmul.f32 1.442695, %v827_v39 }
 0x22f   :  { %v839_v23 = vmul.f32 1.442695, %v823_v34 }
 0x230   :  { %1277 = vpow2.f32 %v847_v46 }
 0x231   :  { %1279 = vpow2.f32 %v839_v23 }
 0x236   :  { %v1278_v47 = vpop.eup %1277 }
 0x237   :  { %v1280_v38 = vpop.eup %1279  ;;  %v2187_v44 = vsel %vm102_vm11, %v1278_v47, 0.0 }
 0x238   :  { %895 = vadd.xlane.f32.xlu2 %v2187_v44  ;;  %v2192_v52 = vsel %vm98_vm0, %v1280_v38, 0.0  ;;  %vm2344_vm0 = vmmov %vm2326_vm2 }
 0x239   :  { %887 = vadd.xlane.f32.xlu1 %v2192_v52 }
 0x23b   :  { %v802_v10 = vpop.xlane.xlu2 %801 }
 0x23c   :  { %v794_v6 = vpop.xlane.xlu1 %793  ;;  %v828_v48 = vsub.f32 %v2082_v3, %v802_v10 }
 0x23d   :  { %v824_v43 = vsub.f32 %v2086_v33, %v794_v6 }
 0x23e   :  { %v849_v49 = vmul.f32 1.442695, %v828_v48 }
 0x23f   :  { %v841_v27 = vmul.f32 1.442695, %v824_v43 }
 0x240   :  { %1281 = vpow2.f32 %v849_v49 }
 0x241   :  { %1283 = vpow2.f32 %v841_v27 }
 0x243   :  { %v796_v5 = vpop.xlane.xlu2 %795 }
 0x244   :  { %v825_v61 = vsub.f32 %v2097_v18, %v796_v5 }
 0x246   :  { %v1282_v13 = vpop.eup %1281  ;;  %v843_v41 = vmul.f32 1.442695, %v825_v61 }
 0x247   :  { %v1284_v54 = vpop.eup %1283  ;;  %v2200_v21 = vsel %vm103_vm12, %v1282_v13, 0.0 }
 0x248   :  { %1285 = vpow2.f32 %v843_v41  ;;  %897 = vadd.xlane.f32.xlu0 %v2200_v21  ;;  %v2205_v3 = vsel %vm99_vm5, %v1284_v54, 0.0 }
 0x249   :  { %889 = vadd.xlane.f32.xlu2 %v2205_v3 }
 0x24a   :  { %v804_v18 = vpop.xlane.xlu0 %803 }
 0x24b   :  { %v808_v33 = vpop.xlane.xlu2 %807  ;;  %v829_v1 = vsub.f32 %v2114_v15, %v804_v18 }
 0x24c   :  { %v831_v22 = vsub.f32 %v2109_v12, %v808_v33 }
 0x24d   :  { %v851_v26 = vmul.f32 1.442695, %v829_v1 }
 0x24e   :  { %v1286_v58 = vpop.eup %1285  ;;  %v855_v40 = vmul.f32 1.442695, %v831_v22 }
 0x24f   :  { %v2212_v11 = vsel %vm100_vm4, %v1286_v58, 0.0  ;;  %vm2345_vm4 = vmmov %vm2327_vm6 }
 0x250   :  { %1287 = vpow2.f32 %v855_v40  ;;  %891 = vadd.xlane.f32.xlu0 %v2212_v11 }
 0x251   :  { %1289 = vpow2.f32 %v851_v26 }
 0x252   :  { %v798_v55 = vpop.xlane.xlu0 %797 }
 0x253   :  { %v826_v0 = vsub.f32 %v2125_v53, %v798_v55 }
 0x255   :  { %v806_v4 = vpop.xlane.xlu1 %805  ;;  %v845_v60 = vmul.f32 1.442695, %v826_v0 }
 0x256   :  { %v1288_v57 = vpop.eup %1287  ;;  %v830_v12 = vsub.f32 %v2131_v19, %v806_v4 }
 0x257   :  { %v2219_v30 = vsel %vm106_vm3, %v1288_v57, 0.0  ;;  %v1290_v15 = vpop.eup %1289  ;;  %1291 = vpow2.f32 %v845_v60 }
 0x258   :  { %903 = vadd.xlane.f32.xlu0 %v2219_v30  ;;  %v853_v45 = vmul.f32 1.442695, %v830_v12  ;;  %v2224_v59 = vsel %vm104_vm8, %v1290_v15, 0.0 }
 0x259   :  { %899 = vadd.xlane.f32.xlu1 %v2224_v59 }
 0x25a   :  { %1293 = vpow2.f32 %v853_v45  ;;  %v814_v53 = vpop.xlane.xlu2 %813  ;;  %v810_v37 = vpop.xlane.xlu0 %809 }
 0x25b   :  { %v834_v19 = vsub.f32 %v2142_v8, %v814_v53  ;;  %v832_v25 = vsub.f32 %v2146_v32, %v810_v37 }
 0x25d   :  { %v812_v17 = vpop.xlane.xlu1 %811  ;;  %v861_v31 = vmul.f32 1.442695, %v834_v19  ;;  %v1292_v39 = vpop.eup %1291  ;;  %v857_v9 = vmul.f32 1.442695, %v832_v25 }
 0x25e   :  { %v833_v62 = vsub.f32 %v2153_v42, %v812_v17  ;;  %v2232_v46 = vsel %vm2344_vm0, %v1292_v39, 0.0 }
 0x25f   :  { %1295 = vpow2.f32 %v861_v31 }
 0x260   :  { %v1294_v34 = vpop.eup %1293  ;;  %v859_v16 = vmul.f32 1.442695, %v833_v62  ;;  %1297 = vpow2.f32 %v857_v9 }
 0x261   :  { %893 = vadd.xlane.f32.xlu1 %v2232_v46  ;;  %v2237_v8 = vsel %vm2345_vm4, %v1294_v34, 0.0 }
 0x262   :  { %1299 = vpow2.f32 %v859_v16  ;;  %901 = vadd.xlane.f32.xlu2 %v2237_v8  ;;  %v816_v32 = vpop.xlane.xlu0 %815 }
 0x263   :  { %v835_v42 = vsub.f32 %v2161_v51, %v816_v32 }
 0x265   :  { %v818_v23 = vpop.xlane.xlu1 %817  ;;  %v1296_v47 = vpop.eup %1295  ;;  %v863_v10 = vmul.f32 1.442695, %v835_v42 }
 0x266   :  { %v836_v38 = vsub.f32 %v2167_v56, %v818_v23  ;;  %v1298_v2 = vpop.eup %1297  ;;  %v2244_v6 = vsel %vm109_vm15, %v1296_v47, 0.0 }
 0x267   :  { %909 = vadd.xlane.f32.xlu0 %v2244_v6  ;;  %v2249_v43 = vsel %vm107_vm14, %v1298_v2, 0.0  ;;  %1301 = vpow2.f32 %v863_v10 }
 0x268   :  { %v1300_v48 = vpop.eup %1299  ;;  %v865_v20 = vmul.f32 1.442695, %v836_v38 }
 0x269   :  { %905 = vadd.xlane.f32.xlu1 %v2249_v43  ;;  %v2254_v51 = vsel %vm108_vm1, %v1300_v48, 0.0 }
 0x26a   :  { %1303 = vpow2.f32 %v865_v20  ;;  %907 = vadd.xlane.f32.xlu2 %v2254_v51  ;;  %v820_v50 = vpop.xlane.xlu2 %819  ;;  %v822_v49 = vpop.xlane.xlu0 %821 }
 0x26b   :  { %v837_v56 = vsub.f32 %v2175_v29, %v820_v50  ;;  %v838_v27 = vsub.f32 %v2179_v24, %v822_v49 }
 0x26d   :  { %v867_v5 = vmul.f32 1.442695, %v837_v56  ;;  %v1302_v28 = vpop.eup %1301  ;;  %v869_v61 = vmul.f32 1.442695, %v838_v27 }
 0x26e   :  { %v2261_v41 = vsel %vm110_vm9, %v1302_v28, 0.0 }
 0x26f   :  { %1305 = vpow2.f32 %v867_v5 }
 0x270   :  { %v1304_v13 = vpop.eup %1303  ;;  %1307 = vpow2.f32 %v869_v61 }
 0x271   :  { %911 = vadd.xlane.f32.xlu1 %v2261_v41  ;;  %v2266_v36 = vsel %vm111_vm13, %v1304_v13, 0.0 }
 0x272   :  { %913 = vadd.xlane.f32.xlu2 %v2266_v36 }
 0x275   :  { %v1306_v29 = vpop.eup %1305 }
 0x276   :  { %v1308_v24 = vpop.eup %1307  ;;  %v2271_v54 = vsel %vm112_vm7, %v1306_v29, 0.0 }
 0x277   :  { %915 = vadd.xlane.f32.xlu0 %v2271_v54  ;;  %v2276_v63 = vsel %vm113_vm10, %v1308_v24, 0.0 }
 0x279   :  { %917 = vadd.xlane.f32.xlu1 %v2276_v63 }
 0x2ab   :  { %v896_v33 = vpop.xlane.xlu2 %895 }
 0x2ac   :  { %v923_v7 = vadd.f32 1e-16, %v896_v33  ;;  %v888_v22 = vpop.xlane.xlu1 %887 }
 0x2ad   :  { %v919_v18 = vadd.f32 1e-16, %v888_v22 }
 0x2ae   :  { %1309 = vrcp.f32 %v923_v7 }
 0x2af   :  { %1311 = vrcp.f32 %v919_v18 }
 0x2b4   :  { %v1310_v58 = vpop.eup %1309 }
 0x2b5   :  { %v1312_v40 = vpop.eup %1311  ;;  %v955_v35 = vmul.f32 %v1310_v58, %v2187_v44  ;;  %v1035_v58 = vld [vmem:[#allocation3] sm:$0x1] }
 0x2b6   :  { %v951_v1 = vmul.f32 %v1312_v40, %v2192_v52 }
 0x2b7   :  { %971 = vst [vmem:[#allocation9 + $0x20] sm:$0xff] %v955_v35 }
 0x2b8   :  { %967 = vst [vmem:[#allocation9] sm:$0xff] %v951_v1 }
 0x2bb   :  { %v898_v26 = vpop.xlane.xlu0 %897 }
 0x2bc   :  { %v890_v14 = vpop.xlane.xlu2 %889  ;;  %v924_v55 = vadd.f32 1e-16, %v898_v26 }
 0x2bd   :  { %v920_v57 = vadd.f32 1e-16, %v890_v14 }
 0x2be   :  { %1313 = vrcp.f32 %v924_v55 }
 0x2bf   :  { %1315 = vrcp.f32 %v920_v57  ;;  %v1036_v57 = vmax.f32 %v1035_v58, 1.0 }
 0x2c1   :  { %vm1042_vm5 = vweird.f32 %v1036_v57 }
 0x2c3   :  { %v892_v0 = vpop.xlane.xlu0 %891 }
 0x2c4   :  { %v1314_v4 = vpop.eup %1313  ;;  %v921_v12 = vadd.f32 1e-16, %v892_v0 }
 0x2c5   :  { %v1316_v15 = vpop.eup %1315  ;;  %v956_v60 = vmul.f32 %v1314_v4, %v2200_v21 }
 0x2c6   :  { %v952_v45 = vmul.f32 %v1316_v15, %v2205_v3  ;;  %1317 = vrcp.f32 %v921_v12 }
 0x2c7   :  { %972 = vst [vmem:[#allocation9 + $0x28] sm:$0xff] %v956_v60 }
 0x2c8   :  { %968 = vst [vmem:[#allocation9 + $0x8] sm:$0xff] %v952_v45  ;;  %v984_v16 = vadd.f32 %v952_v45, %v951_v1 }
 0x2cb   :  { %v904_v44 = vpop.xlane.xlu0 %903 }
 0x2cc   :  { %v1318_v52 = vpop.eup %1317  ;;  %v927_v53 = vadd.f32 1e-16, %v904_v44  ;;  %v900_v37 = vpop.xlane.xlu1 %899 }
 0x2cd   :  { %v953_v19 = vmul.f32 %v1318_v52, %v2212_v11  ;;  %v925_v25 = vadd.f32 1e-16, %v900_v37 }
 0x2ce   :  { %1319 = vrcp.f32 %v927_v53 }
 0x2cf   :  { %969 = vst [vmem:[#allocation9 + $0x10] sm:$0xff] %v953_v19  ;;  %1321 = vrcp.f32 %v925_v25 }
 0x2d4   :  { %v1320_v17 = vpop.eup %1319  ;;  %v894_v62 = vpop.xlane.xlu1 %893 }
 0x2d5   :  { %v959_v31 = vmul.f32 %v1320_v17, %v2219_v30  ;;  %v1322_v21 = vpop.eup %1321  ;;  %v922_v39 = vadd.f32 1e-16, %v894_v62  ;;  %v902_v3 = vpop.xlane.xlu2 %901  ;;  %v985_v30 = vadd.f32 %v984_v16, %v953_v19 }
 0x2d6   :  { %v957_v9 = vmul.f32 %v1322_v21, %v2224_v59  ;;  %v926_v34 = vadd.f32 1e-16, %v902_v3 }
 0x2d7   :  { %975 = vst [vmem:[#allocation9 + $0x40] sm:$0xff] %v959_v31  ;;  %1323 = vrcp.f32 %v922_v39  ;;  %v1048_v39 = vand.u32 2147483648, %v1036_v57 }
 0x2d8   :  { %973 = vst [vmem:[#allocation9 + $0x30] sm:$0xff] %v957_v9  ;;  %1325 = vrcp.f32 %v926_v34  ;;  %v1046_v34 = vand.u32 2147483647, %v1036_v57 }
 0x2da   :  { %v910_v11 = vpop.xlane.xlu0 %909  ;;  %vm1047_vm12 = vcmp.eq.f32.partialorder %v1046_v34, 8.507059e+37 }
 0x2db   :  { %v930_v42 = vadd.f32 1e-16, %v910_v11  ;;  %v1049_v11 = vor.u32 1.1754944e-38, %v1048_v39 }
 0x2dc   :  { %v906_v32 = vpop.xlane.xlu1 %905 }
 0x2dd   :  { %v1324_v23 = vpop.eup %1323  ;;  %v928_v47 = vadd.f32 1e-16, %v906_v32  ;;  %v908_v38 = vpop.xlane.xlu2 %907  ;;  %1327 = vrcp.f32 %v930_v42 }
 0x2de   :  { %v1326_v2 = vpop.eup %1325  ;;  %v954_v10 = vmul.f32 %v1324_v23, %v2232_v46  ;;  %v929_v48 = vadd.f32 1e-16, %v908_v38 }
 0x2df   :  { %v958_v59 = vmul.f32 %v1326_v2, %v2237_v8  ;;  %1329 = vrcp.f32 %v928_v47 }
 0x2e0   :  { %970 = vst [vmem:[#allocation9 + $0x18] sm:$0xff] %v954_v10  ;;  %v986_v20 = vadd.f32 %v985_v30, %v954_v10  ;;  %1331 = vrcp.f32 %v929_v48 }
 0x2e1   :  { %974 = vst [vmem:[#allocation9 + $0x38] sm:$0xff] %v958_v59 }
 0x2e2   :  { %v987_v50 = vadd.f32 %v986_v20, %v955_v35 }
 0x2e3   :  { %v1328_v56 = vpop.eup %1327 }
 0x2e4   :  { %v988_v49 = vadd.f32 %v987_v50, %v956_v60  ;;  %v912_v27 = vpop.xlane.xlu1 %911  ;;  %v962_v28 = vmul.f32 %v1328_v56, %v2244_v6 }
 0x2e5   :  { %v1330_v5 = vpop.eup %1329  ;;  %v931_v61 = vadd.f32 1e-16, %v912_v27  ;;  %v914_v13 = vpop.xlane.xlu2 %913 }
 0x2e6   :  { %v1332_v29 = vpop.eup %1331  ;;  %v989_v46 = vadd.f32 %v988_v49, %v957_v9  ;;  %v960_v24 = vmul.f32 %v1330_v5, %v2249_v43  ;;  %v932_v33 = vadd.f32 1e-16, %v914_v13  ;;  %978 = vst [vmem:[#allocation9 + $0x58] sm:$0xff] %v962_v28 }
 0x2e7   :  { %v961_v8 = vmul.f32 %v1332_v29, %v2254_v51  ;;  %1333 = vrcp.f32 %v931_v61 }
 0x2e8   :  { %v990_v7 = vadd.f32 %v989_v46, %v958_v59  ;;  %976 = vst [vmem:[#allocation9 + $0x48] sm:$0xff] %v960_v24  ;;  %1335 = vrcp.f32 %v932_v33 }
 0x2e9   :  { %977 = vst [vmem:[#allocation9 + $0x50] sm:$0xff] %v961_v8 }
 0x2ea   :  { %v991_v22 = vadd.f32 %v990_v7, %v959_v31  ;;  %v916_v18 = vpop.xlane.xlu0 %915 }
 0x2eb   :  { %v933_v35 = vadd.f32 1e-16, %v916_v18 }
 0x2ec   :  { %v992_v40 = vadd.f32 %v991_v22, %v960_v24  ;;  %v918_v6 = vpop.xlane.xlu1 %917 }
 0x2ed   :  { %v1334_v1 = vpop.eup %1333  ;;  %v934_v26 = vadd.f32 1e-16, %v918_v6  ;;  %1337 = vrcp.f32 %v933_v35 }
 0x2ee   :  { %v1336_v14 = vpop.eup %1335  ;;  %v993_v55 = vadd.f32 %v992_v40, %v961_v8  ;;  %v963_v43 = vmul.f32 %v1334_v1, %v2261_v41 }
 0x2ef   :  { %v964_v51 = vmul.f32 %v1336_v14, %v2266_v36  ;;  %1339 = vrcp.f32 %v934_v26 }
 0x2f0   :  { %979 = vst [vmem:[#allocation9 + $0x60] sm:$0xff] %v963_v43  ;;  %v994_v0 = vadd.f32 %v993_v55, %v962_v28  ;;  %1341 = vrcp.f32 %v1036_v57 }
 0x2f1   :  { %980 = vst [vmem:[#allocation9 + $0x68] sm:$0xff] %v964_v51 }
 0x2f2   :  { %v995_v4 = vadd.f32 %v994_v0, %v963_v43 }
 0x2f3   :  { %v1338_v12 = vpop.eup %1337 }
 0x2f4   :  { %v996_v60 = vadd.f32 %v995_v4, %v964_v51  ;;  %v965_v41 = vmul.f32 %v1338_v12, %v2271_v54 }
 0x2f5   :  { %v1340_v15 = vpop.eup %1339 }
 0x2f6   :  { %v966_v45 = vmul.f32 %v1340_v15, %v2276_v63  ;;  %981 = vst [vmem:[#allocation9 + $0x70] sm:$0xff] %v965_v41  ;;  %v997_v36 = vadd.f32 %v996_v60, %v965_v41  ;;  %v1342_v44 = vpop.eup %1341  ;;  %v983_v63 = vld [vmem:[#allocation2] sm:$0x1] }
 0x2f7   :  { %v1038_v19 = vmul.f32 %v1342_v44, %v1036_v57  ;;  %vm1043_vm8 = vweird.f32 %v1342_v44 }
 0x2f8   :  { %982 = vst [vmem:[#allocation9 + $0x78] sm:$0xff] %v966_v45  ;;  %v998_v52 = vadd.f32 %v997_v36, %v966_v45  ;;  %vm1044_vm11 = vmor %vm1042_vm5, %vm1043_vm8 }
 0x2f9   :  { %1065 = dma.vmem_to_hbm [thread:$0]  %s1058_s3, 2048, %s1060_s26, [#allocation6], %s1448_s29, %s1448_s29, %s1449_s30   ;;  %v1039_v17 = vsub.f32 1.0, %v1038_v19 }
 0x2fa   :  { %v999_v53 = vrot.slane %v998_v52, 4  ;;  %s1071_s29 = sshll.u32 %s1454_s5, 4  ;;  %s1072_s29 = int_to_ptr.vmem [resolvable:$true] %s1071_s29 }
 0x2fb   :  { %v1040_v62 = vmul.f32 %v1342_v44, %v1039_v17 }
 0x2fc   :  { %v1000_v37 = vadd.f32 %v999_v53, %v998_v52 }
 0x2fd   :  { %v1041_v9 = vadd.f32 %v1342_v44, %v1040_v62 }
 0x2fe   :  { %v1001_v25 = vrot.slane %v1000_v37, 2 }
 0x2ff   :  { %v1045_v16 = vsel %vm1044_vm11, %v1342_v44, %v1041_v9 }
 0x300   :  { %v1002_v31 = vadd.f32 %v1001_v25, %v1000_v37  ;;  %v1050_v32 = vsel %vm1047_vm12, %v1049_v11, %v1045_v16 }
 0x302   :  { %v1003_v54 = vrot.slane %v1002_v31, 1 }
 0x304   :  { %v1004_v21 = vadd.f32 %v1003_v54, %v1002_v31 }
 0x306   :  { %v1005_v3 = vadd.f32 %v1004_v21, %v983_v63 }
 0x308   :  { %1006 = vst [vmem:[#allocation2] sm:$0x1] %v1005_v3 }
 0x30f   :  { %v1034_v42 = vld [vmem:[#allocation2] sm:$0x1] }
 0x310   :  { %v1051_v23 = vmul.f32 %v1050_v32, %v1034_v42 }
 0x312   :  { %1052 = vst [vmem:[#allocation10] sm:$0x1] %v1051_v23 }
 0x313   :  { %1076 = dma.vmem_to_hbm [thread:$0]  %s1072_s29, 16, %s1074_s28, [#allocation11]  }
 0x314   :  { %1443 = dma.done.wait [#allocation6], 2048  }
 0x315   :  { %1444 = vsyncadd [#allocation6], 4294965248 }
 0x316   :  { %1445 = dma.done.wait [#allocation11], 16  }
 0x317   :  { %1446 = vsyncadd [#allocation11], 4294967280 }
 0x318   :  { %1085 = vsyncpa [#allocation5], 1 }
 0x319   :  { %1086 = vsyncpa [#allocation8], 1 }
 0x31a   :  { %1087 = vsyncpa [#allocation6], 1 }
 0x31b   :  { %1088 = vsyncpa [#allocation11], 1 }

</bundles_post_ra>
